<compile_context>
chip_gen: v5e
topology: v5e:2x2
jax: 0.10.0
libtpu: 0.0.40
codegen_flags: <defaults>
</compile_context>

<pallas_src>
import functools

import jax
import jax.numpy as jnp
from jax.experimental import pallas as pl
from jax.experimental.pallas import tpu as pltpu


def _layer_norm(v, gamma, beta, eps=1e-5):
    mu = jnp.mean(v, axis=-1, keepdims=True)
    var = jnp.mean(jnp.square(v - mu), axis=-1, keepdims=True)
    return (v - mu) * jax.lax.rsqrt(var + eps) * gamma + beta


def block_kernel(x_ref,
                 wqkv_ref, wp_ref,
                 w1_ref, b1_ref, w2_ref,
                 vecs_ref,
                 o_ref, *, n_head, matmul_dtype):
    x = x_ref[...].astype(jnp.float32)                       # (bt, T, C)
    bt, T, C = x.shape
    hs = C // n_head
    rows = bt * T

    # Packed per-channel vectors: g1, be1, g2, be2, bp(attn-proj bias), b2(ffn-out bias)
    g1, be1, g2, be2, bp, b2 = (vecs_ref[i] for i in range(6))

    def mm(a, w):
        # MXU matmul with f32 accumulation; operands optionally bf16.
        return jnp.dot(a.astype(matmul_dtype), w.astype(matmul_dtype),
                       preferred_element_type=jnp.float32)

    x2d = x.reshape(rows, C)                                 # fuse batch rows

    # ---- ln1 + fused QKV projection + multi-head causal self-attention ----
    xn = _layer_norm(x2d, g1, be1)                           # f32 elementwise
    qkv = mm(xn, wqkv_ref[...])                              # (rows, 3C): one MXU pass
    q, k, v = qkv[:, :C], qkv[:, C:2 * C], qkv[:, 2 * C:]

    def to_heads(a):                                         # (rows,C) -> (bt*H,T,hs)
        a = a.reshape(bt, T, n_head, hs)
        a = jnp.transpose(a, (0, 2, 1, 3))                   # (bt, H, T, hs)
        return a.reshape(bt * n_head, T, hs)

    qh, kh, vh = to_heads(q), to_heads(k), to_heads(v)

    # NOTE: reference scales by n_embed**-0.5 (C), not head_size**-0.5.
    scale = C ** (-0.5)
    wei = jnp.einsum('bqd,bkd->bqk',
                     qh.astype(matmul_dtype), kh.astype(matmul_dtype),
                     preferred_element_type=jnp.float32) * scale
    row_i = jax.lax.broadcasted_iota(jnp.int32, (T, T), 0)
    col_i = jax.lax.broadcasted_iota(jnp.int32, (T, T), 1)
    causal = (row_i >= col_i)[None, :, :]
    wei = jnp.where(causal, wei, -1e30)                      # large-finite: NaN-safe
    wei = wei - jnp.max(wei, axis=-1, keepdims=True)
    e = jnp.exp(wei)
    p = e * pl.reciprocal(jnp.sum(e, axis=-1, keepdims=True), approx=True)

    att = jnp.einsum('bqk,bkd->bqd',
                     p.astype(matmul_dtype), vh.astype(matmul_dtype),
                     preferred_element_type=jnp.float32)     # (bt*H, T, hs)
    sa = att.reshape(bt, n_head, T, hs)
    sa = jnp.transpose(sa, (0, 2, 1, 3)).reshape(rows, C)

    x1 = x2d + mm(sa, wp_ref[...]) + bp                      # residual 1

    # ---- ln2 + feed-forward (Linear -> ReLU -> proj) ----
    x2n = _layer_norm(x1, g2, be2)
    ff = jnp.maximum(mm(x2n, w1_ref[...]) + b1_ref[0], 0.0)
    ff = mm(ff, w2_ref[...]) + b2

    o_ref[...] = (x1 + ff).reshape(bt, T, C).astype(o_ref.dtype)   # residual 2


def _pick_batch_tile(B, T, target_rows=256):
    """Largest divisor of B whose tile holds ~target_rows fused rows."""
    bt = max(1, min(B, max(1, target_rows // max(T, 1))))
    while B % bt:
        bt -= 1
    return bt


def block_forward(x, params, *, n_head, matmul_dtype=jnp.float32,
                  target_rows=256):
    B, T, C = x.shape
    bt = _pick_batch_tile(B, T, target_rows)
    grid = (B // bt,)

    # Host-side weight packing (cheap, outside the kernel):
    #  - fused QKV weight (C, 3C)
    #  - all per-channel (C,) vectors stacked into one (6, C) array
    wqkv = jnp.concatenate([params["wq"], params["wk"], params["wv"]], axis=1)
    vecs = jnp.concatenate([params["g1"], params["be1"],
                            params["g2"], params["be2"],
                            params["bp"], params["b2"]], axis=0)  # (6, C)

    weights = [wqkv, params["wp"], params["w1"], params["b1"], params["w2"], vecs]

    def const_spec(arr):
        nd = arr.ndim
        return pl.BlockSpec(arr.shape, lambda i, _nd=nd: (0,) * _nd)

    in_specs = [pl.BlockSpec((bt, T, C), lambda i: (i, 0, 0))]
    in_specs += [const_spec(w) for w in weights]

    kernel = functools.partial(block_kernel, n_head=n_head,
                               matmul_dtype=matmul_dtype)

    return pl.pallas_call(
        kernel,
        out_shape=jax.ShapeDtypeStruct((B, T, C), x.dtype),
        grid_spec=pltpu.PrefetchScalarGridSpec(
            num_scalar_prefetch=0,
            grid=grid,
            in_specs=in_specs,
            out_specs=pl.BlockSpec((bt, T, C), lambda i: (i, 0, 0)),
        ),
        compiler_params=pltpu.CompilerParams(
            dimension_semantics=("parallel",),      # megacore-friendly (v7x 2 TCs)
            vmem_limit_bytes=64 * 1024 * 1024,      # stay within v7x VMEM budget
        ),
    )(x, *weights)


def make_params(key, n_embed, n_head):
    ks = jax.random.split(key, 10)
    s = 0.05
    C = n_embed
    params = {
        "wq": jax.random.normal(ks[0], (C, C), jnp.float32) * s,
        "wk": jax.random.normal(ks[1], (C, C), jnp.float32) * s,
        "wv": jax.random.normal(ks[2], (C, C), jnp.float32) * s,
        "wp": jax.random.normal(ks[3], (C, C), jnp.float32) * s,
        "bp": jax.random.normal(ks[4], (1, C), jnp.float32) * s,
        "w1": jax.random.normal(ks[5], (C, 4 * C), jnp.float32) * s,
        "b1": jax.random.normal(ks[6], (1, 4 * C), jnp.float32) * s,
        "w2": jax.random.normal(ks[7], (4 * C, C), jnp.float32) * s,
        "b2": jax.random.normal(ks[8], (1, C), jnp.float32) * s,
        "g1": jnp.ones((1, C), jnp.float32),
        "be1": jnp.zeros((1, C), jnp.float32),
        "g2": jnp.ones((1, C), jnp.float32),
        "be2": jnp.zeros((1, C), jnp.float32),
    }
    return params


def reference_block(x, p, n_head):
    """Pure-JAX reference mirroring the PyTorch forward (dropout = identity)."""
    B, T, C = x.shape
    hs = C // n_head

    def ln(v, g, b):
        mu = v.mean(-1, keepdims=True)
        var = ((v - mu) ** 2).mean(-1, keepdims=True)
        return (v - mu) / jnp.sqrt(var + 1e-5) * g + b

    xn = ln(x, p["g1"][0], p["be1"][0])
    q = xn @ p["wq"]
    k = xn @ p["wk"]
    v = xn @ p["wv"]
    mask = jnp.tril(jnp.ones((T, T), bool))
    outs = []
    for h in range(n_head):
        qh, kh, vh = (a[..., h * hs:(h + 1) * hs] for a in (q, k, v))
        wei = jnp.einsum("btd,bsd->bts", qh, kh) * C ** (-0.5)
        wei = jnp.where(mask, wei, -jnp.inf)
        wei = jax.nn.softmax(wei, axis=-1)
        outs.append(jnp.einsum("bts,bsd->btd", wei, vh))
    sa = jnp.concatenate(outs, axis=-1) @ p["wp"] + p["bp"][0]
    x1 = x + sa
    x2n = ln(x1, p["g2"][0], p["be2"][0])
    ff = jax.nn.relu(x2n @ p["w1"] + p["b1"][0]) @ p["w2"] + p["b2"][0]
    return x1 + ff


if __name__ == "__main__":
    # Small shapes consistent with the module: B=2, T=block_size=8, n_embed=32, n_head=4.
    B, T, n_embed, n_head = 2, 8, 32, 4
    key = jax.random.PRNGKey(0)
    kx, kp = jax.random.split(key)
    x = jax.random.normal(kx, (B, T, n_embed), jnp.float32)
    params = make_params(kp, n_embed, n_head)

    ref = reference_block(x, params, n_head)

    # f32 MXU-operand path (exact semantics; tolerance absorbs approx reciprocal).
    out = jax.block_until_ready(block_forward(x, params, n_head=n_head))
    assert out.shape == (B, T, n_embed)
    assert jnp.allclose(out, ref, atol=2e-3, rtol=2e-3), "mismatch vs reference (f32)"

    # bf16 MXU-operand path (v6e/v7x fast path): f32 accumulation, looser tolerance.
    out_bf16 = jax.block_until_ready(
        block_forward(x, params, n_head=n_head, matmul_dtype=jnp.bfloat16))
    assert out_bf16.shape == (B, T, n_embed)
    assert jnp.allclose(out_bf16, ref, atol=5e-2, rtol=5e-2), "mismatch vs reference (bf16)"

    print("KERNEL_OK")
</pallas_src>

<mosaic_0001>
module attributes {stable_mosaic.version = 11 : i64} {
  func.func @block_kernel(%arg0: i32, %arg1: memref<2x8x32xf32, #tpu.memory_space<vmem>>, %arg2: memref<32x96xf32, #tpu.memory_space<vmem>>, %arg3: memref<32x32xf32, #tpu.memory_space<vmem>>, %arg4: memref<32x128xf32, #tpu.memory_space<vmem>>, %arg5: memref<1x128xf32, #tpu.memory_space<vmem>>, %arg6: memref<128x32xf32, #tpu.memory_space<vmem>>, %arg7: memref<6x32xf32, #tpu.memory_space<vmem>>, %arg8: memref<2x8x32xf32, #tpu.memory_space<vmem>>) attributes {dimension_semantics = [#tpu.dimension_semantics<parallel>], iteration_bounds = array<i64: 1>, scalar_prefetch = 0 : i64, scratch_operands = 0 : i64, tpu.core_type = #tpu.core_type<tc>, window_params = [{transform_indices = @transform_0, window_bounds = array<i64: 2, 8, 32>}, {pipeline_mode = #tpu.pipeline_mode<synchronous>, transform_indices = @transform_1, window_bounds = array<i64: 32, 96>}, {pipeline_mode = #tpu.pipeline_mode<synchronous>, transform_indices = @transform_2, window_bounds = array<i64: 32, 32>}, {pipeline_mode = #tpu.pipeline_mode<synchronous>, transform_indices = @transform_3, window_bounds = array<i64: 32, 128>}, {pipeline_mode = #tpu.pipeline_mode<synchronous>, transform_indices = @transform_4, window_bounds = array<i64: 1, 128>}, {pipeline_mode = #tpu.pipeline_mode<synchronous>, transform_indices = @transform_5, window_bounds = array<i64: 128, 32>}, {pipeline_mode = #tpu.pipeline_mode<synchronous>, transform_indices = @transform_6, window_bounds = array<i64: 6, 32>}, {transform_indices = @transform_7, window_bounds = array<i64: 2, 8, 32>}]} {
    %c0 = arith.constant 0 : index
    %c0_0 = arith.constant 0 : index
    %c0_1 = arith.constant 0 : index
    %0 = vector.load %arg1[%c0, %c0_0, %c0_1] : memref<2x8x32xf32, #tpu.memory_space<vmem>>, vector<2x8x32xf32>
    %c0_2 = arith.constant 0 : index
    %c0_3 = arith.constant 0 : index
    %1 = vector.load %arg7[%c0_2, %c0_3] : memref<6x32xf32, #tpu.memory_space<vmem>>, vector<1x32xf32>
    %2 = vector.shape_cast %1 : vector<1x32xf32> to vector<32xf32>
    %c1 = arith.constant 1 : index
    %c0_4 = arith.constant 0 : index
    %3 = vector.load %arg7[%c1, %c0_4] : memref<6x32xf32, #tpu.memory_space<vmem>>, vector<1x32xf32>
    %4 = vector.shape_cast %3 : vector<1x32xf32> to vector<32xf32>
    %c2 = arith.constant 2 : index
    %c0_5 = arith.constant 0 : index
    %5 = vector.load %arg7[%c2, %c0_5] : memref<6x32xf32, #tpu.memory_space<vmem>>, vector<1x32xf32>
    %6 = vector.shape_cast %5 : vector<1x32xf32> to vector<32xf32>
    %c3 = arith.constant 3 : index
    %c0_6 = arith.constant 0 : index
    %7 = vector.load %arg7[%c3, %c0_6] : memref<6x32xf32, #tpu.memory_space<vmem>>, vector<1x32xf32>
    %8 = vector.shape_cast %7 : vector<1x32xf32> to vector<32xf32>
    %c4 = arith.constant 4 : index
    %c0_7 = arith.constant 0 : index
    %9 = vector.load %arg7[%c4, %c0_7] : memref<6x32xf32, #tpu.memory_space<vmem>>, vector<1x32xf32>
    %10 = vector.shape_cast %9 : vector<1x32xf32> to vector<32xf32>
    %c5 = arith.constant 5 : index
    %c0_8 = arith.constant 0 : index
    %11 = vector.load %arg7[%c5, %c0_8] : memref<6x32xf32, #tpu.memory_space<vmem>>, vector<1x32xf32>
    %12 = vector.shape_cast %11 : vector<1x32xf32> to vector<32xf32>
    %13 = vector.shape_cast %0 : vector<2x8x32xf32> to vector<16x32xf32>
    %cst = arith.constant dense<0.000000e+00> : vector<16xf32>
    %14 = vector.multi_reduction <add>, %13, %cst [1] : vector<16x32xf32> to vector<16xf32>
    %15 = vector.shape_cast %14 : vector<16xf32> to vector<16x1xf32>
    %cst_9 = arith.constant 3.200000e+01 : f32
    %16 = vector.broadcast %cst_9 : f32 to vector<16x1xf32>
    %17 = arith.divf %15, %16 : vector<16x1xf32>
    %18 = vector.broadcast %17 : vector<16x1xf32> to vector<16x32xf32>
    %19 = arith.subf %13, %18 : vector<16x32xf32>
    %20 = arith.mulf %19, %19 : vector<16x32xf32>
    %cst_10 = arith.constant dense<0.000000e+00> : vector<16xf32>
    %21 = vector.multi_reduction <add>, %20, %cst_10 [1] : vector<16x32xf32> to vector<16xf32>
    %22 = vector.shape_cast %21 : vector<16xf32> to vector<16x1xf32>
    %cst_11 = arith.constant 3.200000e+01 : f32
    %23 = vector.broadcast %cst_11 : f32 to vector<16x1xf32>
    %24 = arith.divf %22, %23 : vector<16x1xf32>
    %25 = vector.broadcast %17 : vector<16x1xf32> to vector<16x32xf32>
    %26 = arith.subf %13, %25 : vector<16x32xf32>
    %cst_12 = arith.constant 9.99999974E-6 : f32
    %27 = vector.broadcast %cst_12 : f32 to vector<16x1xf32>
    %28 = arith.addf %24, %27 : vector<16x1xf32>
    %29 = math.rsqrt %28 : vector<16x1xf32>
    %30 = vector.broadcast %29 : vector<16x1xf32> to vector<16x32xf32>
    %31 = arith.mulf %26, %30 : vector<16x32xf32>
    %32 = vector.shape_cast %2 : vector<32xf32> to vector<1x32xf32>
    %33 = vector.broadcast %32 : vector<1x32xf32> to vector<16x32xf32>
    %34 = arith.mulf %31, %33 : vector<16x32xf32>
    %35 = vector.shape_cast %4 : vector<32xf32> to vector<1x32xf32>
    %36 = vector.broadcast %35 : vector<1x32xf32> to vector<16x32xf32>
    %37 = arith.addf %34, %36 : vector<16x32xf32>
    %c0_13 = arith.constant 0 : index
    %c0_14 = arith.constant 0 : index
    %38 = vector.load %arg2[%c0_13, %c0_14] : memref<32x96xf32, #tpu.memory_space<vmem>>, vector<32x96xf32>
    %cst_15 = arith.constant dense<0.000000e+00> : vector<16x96xf32>
    %39 = tpu.matmul %37, %38, %cst_15 {dimension_numbers = #tpu.dot_dimension_numbers<[1], [0], [0], [1], [0, 0, 1, 1], [], []>} : vector<16x32xf32>, vector<32x96xf32>, vector<16x96xf32> -> vector<16x96xf32>
    %40 = vector.extract_strided_slice %39 {offsets = [0, 0], sizes = [16, 32], strides = [1, 1]} : vector<16x96xf32> to vector<16x32xf32>
    %41 = vector.extract_strided_slice %39 {offsets = [0, 32], sizes = [16, 32], strides = [1, 1]} : vector<16x96xf32> to vector<16x32xf32>
    %42 = vector.extract_strided_slice %39 {offsets = [0, 64], sizes = [16, 32], strides = [1, 1]} : vector<16x96xf32> to vector<16x32xf32>
    %43 = vector.shape_cast %40 : vector<16x32xf32> to vector<2x8x4x8xf32>
    %44 = tpu.transpose %43, [0, 2, 1, 3] : vector<2x8x4x8xf32> -> vector<2x4x8x8xf32>
    %45 = vector.shape_cast %44 : vector<2x4x8x8xf32> to vector<8x8x8xf32>
    %46 = vector.shape_cast %41 : vector<16x32xf32> to vector<2x8x4x8xf32>
    %47 = tpu.transpose %46, [0, 2, 1, 3] : vector<2x8x4x8xf32> -> vector<2x4x8x8xf32>
    %48 = vector.shape_cast %47 : vector<2x4x8x8xf32> to vector<8x8x8xf32>
    %49 = vector.shape_cast %42 : vector<16x32xf32> to vector<2x8x4x8xf32>
    %50 = tpu.transpose %49, [0, 2, 1, 3] : vector<2x8x4x8xf32> -> vector<2x4x8x8xf32>
    %51 = vector.shape_cast %50 : vector<2x4x8x8xf32> to vector<8x8x8xf32>
    "tpu.trace_start"() <{level = 10 : i32, message = "bqd,bkd->bqk"}> : () -> ()
    %cst_16 = arith.constant dense<0.000000e+00> : vector<8x8x8xf32>
    %52 = tpu.matmul %45, %48, %cst_16 {dimension_numbers = #tpu.dot_dimension_numbers<[2], [2], [1], [1], [0, 0, 0, 1, 1, 1], [0], [0]>} : vector<8x8x8xf32>, vector<8x8x8xf32>, vector<8x8x8xf32> -> vector<8x8x8xf32>
    "tpu.trace_stop"() : () -> ()
    %cst_17 = arith.constant 0.176776692 : f32
    %53 = vector.broadcast %cst_17 : f32 to vector<8x8x8xf32>
    %54 = arith.mulf %52, %53 : vector<8x8x8xf32>
    %55 = tpu.iota {dimensions = array<i32: 0>} : vector<8x8xi32>
    %56 = tpu.iota {dimensions = array<i32: 1>} : vector<8x8xi32>
    %57 = arith.cmpi sge, %55, %56 : vector<8x8xi32>
    %58 = vector.shape_cast %57 : vector<8x8xi1> to vector<1x8x8xi1>
    %cst_18 = arith.constant -1.000000e+30 : f32
    %59 = vector.shape_cast %58 : vector<1x8x8xi1> to vector<1x8x8xi1>
    %60 = vector.broadcast %59 : vector<1x8x8xi1> to vector<8x8x8xi1>
    %61 = vector.broadcast %cst_18 : f32 to vector<8x8x8xf32>
    %62 = arith.select %60, %54, %61 : vector<8x8x8xi1>, vector<8x8x8xf32>
    %cst_19 = arith.constant dense<0xFF800000> : vector<8x8xf32>
    %63 = vector.multi_reduction <maximumf>, %62, %cst_19 [2] : vector<8x8x8xf32> to vector<8x8xf32>
    %64 = vector.shape_cast %63 : vector<8x8xf32> to vector<8x8x1xf32>
    %65 = vector.broadcast %64 : vector<8x8x1xf32> to vector<8x8x8xf32>
    %66 = arith.subf %62, %65 : vector<8x8x8xf32>
    %67 = math.exp %66 : vector<8x8x8xf32>
    %cst_20 = arith.constant dense<0.000000e+00> : vector<8x8xf32>
    %68 = vector.multi_reduction <add>, %67, %cst_20 [2] : vector<8x8x8xf32> to vector<8x8xf32>
    %69 = vector.shape_cast %68 : vector<8x8xf32> to vector<8x8x1xf32>
    %70 = tpu.reciprocal %69 {approx = true} : vector<8x8x1xf32> -> vector<8x8x1xf32>
    %71 = vector.broadcast %70 : vector<8x8x1xf32> to vector<8x8x8xf32>
    %72 = arith.mulf %67, %71 : vector<8x8x8xf32>
    "tpu.trace_start"() <{level = 10 : i32, message = "bqk,bkd->bqd"}> : () -> ()
    %cst_21 = arith.constant dense<0.000000e+00> : vector<8x8x8xf32>
    %73 = tpu.matmul %72, %51, %cst_21 {dimension_numbers = #tpu.dot_dimension_numbers<[2], [1], [1], [2], [0, 0, 0, 1, 1, 2], [0], [0]>} : vector<8x8x8xf32>, vector<8x8x8xf32>, vector<8x8x8xf32> -> vector<8x8x8xf32>
    "tpu.trace_stop"() : () -> ()
    %74 = vector.shape_cast %73 : vector<8x8x8xf32> to vector<2x4x8x8xf32>
    %75 = tpu.transpose %74, [0, 2, 1, 3] : vector<2x4x8x8xf32> -> vector<2x8x4x8xf32>
    %76 = vector.shape_cast %75 : vector<2x8x4x8xf32> to vector<16x32xf32>
    %c0_22 = arith.constant 0 : index
    %c0_23 = arith.constant 0 : index
    %77 = vector.load %arg3[%c0_22, %c0_23] : memref<32x32xf32, #tpu.memory_space<vmem>>, vector<32x32xf32>
    %cst_24 = arith.constant dense<0.000000e+00> : vector<16x32xf32>
    %78 = tpu.matmul %76, %77, %cst_24 {dimension_numbers = #tpu.dot_dimension_numbers<[1], [0], [0], [1], [0, 0, 1, 1], [], []>} : vector<16x32xf32>, vector<32x32xf32>, vector<16x32xf32> -> vector<16x32xf32>
    %79 = arith.addf %13, %78 : vector<16x32xf32>
    %80 = vector.shape_cast %10 : vector<32xf32> to vector<1x32xf32>
    %81 = vector.broadcast %80 : vector<1x32xf32> to vector<16x32xf32>
    %82 = arith.addf %79, %81 : vector<16x32xf32>
    %cst_25 = arith.constant dense<0.000000e+00> : vector<16xf32>
    %83 = vector.multi_reduction <add>, %82, %cst_25 [1] : vector<16x32xf32> to vector<16xf32>
    %84 = vector.shape_cast %83 : vector<16xf32> to vector<16x1xf32>
    %cst_26 = arith.constant 3.200000e+01 : f32
    %85 = vector.broadcast %cst_26 : f32 to vector<16x1xf32>
    %86 = arith.divf %84, %85 : vector<16x1xf32>
    %87 = vector.broadcast %86 : vector<16x1xf32> to vector<16x32xf32>
    %88 = arith.subf %82, %87 : vector<16x32xf32>
    %89 = arith.mulf %88, %88 : vector<16x32xf32>
    %cst_27 = arith.constant dense<0.000000e+00> : vector<16xf32>
    %90 = vector.multi_reduction <add>, %89, %cst_27 [1] : vector<16x32xf32> to vector<16xf32>
    %91 = vector.shape_cast %90 : vector<16xf32> to vector<16x1xf32>
    %cst_28 = arith.constant 3.200000e+01 : f32
    %92 = vector.broadcast %cst_28 : f32 to vector<16x1xf32>
    %93 = arith.divf %91, %92 : vector<16x1xf32>
    %94 = vector.broadcast %86 : vector<16x1xf32> to vector<16x32xf32>
    %95 = arith.subf %82, %94 : vector<16x32xf32>
    %cst_29 = arith.constant 9.99999974E-6 : f32
    %96 = vector.broadcast %cst_29 : f32 to vector<16x1xf32>
    %97 = arith.addf %93, %96 : vector<16x1xf32>
    %98 = math.rsqrt %97 : vector<16x1xf32>
    %99 = vector.broadcast %98 : vector<16x1xf32> to vector<16x32xf32>
    %100 = arith.mulf %95, %99 : vector<16x32xf32>
    %101 = vector.shape_cast %6 : vector<32xf32> to vector<1x32xf32>
    %102 = vector.broadcast %101 : vector<1x32xf32> to vector<16x32xf32>
    %103 = arith.mulf %100, %102 : vector<16x32xf32>
    %104 = vector.shape_cast %8 : vector<32xf32> to vector<1x32xf32>
    %105 = vector.broadcast %104 : vector<1x32xf32> to vector<16x32xf32>
    %106 = arith.addf %103, %105 : vector<16x32xf32>
    %c0_30 = arith.constant 0 : index
    %c0_31 = arith.constant 0 : index
    %107 = vector.load %arg4[%c0_30, %c0_31] : memref<32x128xf32, #tpu.memory_space<vmem>>, vector<32x128xf32>
    %cst_32 = arith.constant dense<0.000000e+00> : vector<16x128xf32>
    %108 = tpu.matmul %106, %107, %cst_32 {dimension_numbers = #tpu.dot_dimension_numbers<[1], [0], [0], [1], [0, 0, 1, 1], [], []>} : vector<16x32xf32>, vector<32x128xf32>, vector<16x128xf32> -> vector<16x128xf32>
    %c0_33 = arith.constant 0 : index
    %c0_34 = arith.constant 0 : index
    %109 = vector.load %arg5[%c0_33, %c0_34] : memref<1x128xf32, #tpu.memory_space<vmem>>, vector<1x128xf32>
    %110 = vector.shape_cast %109 : vector<1x128xf32> to vector<128xf32>
    %111 = vector.shape_cast %110 : vector<128xf32> to vector<1x128xf32>
    %112 = vector.broadcast %111 : vector<1x128xf32> to vector<16x128xf32>
    %113 = arith.addf %108, %112 : vector<16x128xf32>
    %cst_35 = arith.constant 0.000000e+00 : f32
    %114 = vector.broadcast %cst_35 : f32 to vector<16x128xf32>
    %115 = arith.maximumf %113, %114 : vector<16x128xf32>
    %c0_36 = arith.constant 0 : index
    %c0_37 = arith.constant 0 : index
    %116 = vector.load %arg6[%c0_36, %c0_37] : memref<128x32xf32, #tpu.memory_space<vmem>>, vector<128x32xf32>
    %cst_38 = arith.constant dense<0.000000e+00> : vector<16x32xf32>
    %117 = tpu.matmul %115, %116, %cst_38 {dimension_numbers = #tpu.dot_dimension_numbers<[1], [0], [0], [1], [0, 0, 1, 1], [], []>} : vector<16x128xf32>, vector<128x32xf32>, vector<16x32xf32> -> vector<16x32xf32>
    %118 = vector.shape_cast %12 : vector<32xf32> to vector<1x32xf32>
    %119 = vector.broadcast %118 : vector<1x32xf32> to vector<16x32xf32>
    %120 = arith.addf %117, %119 : vector<16x32xf32>
    %121 = arith.addf %82, %120 : vector<16x32xf32>
    %122 = vector.shape_cast %121 : vector<16x32xf32> to vector<2x8x32xf32>
    %c0_39 = arith.constant 0 : index
    %c0_40 = arith.constant 0 : index
    %c0_41 = arith.constant 0 : index
    %123 = vector.load %arg8[%c0_39, %c0_40, %c0_41] : memref<2x8x32xf32, #tpu.memory_space<vmem>>, vector<2x8x32xf32>
    tpu.vector_store %arg8[%c0_39, %c0_40, %c0_41], %122 {strides = array<i32>} : memref<2x8x32xf32, #tpu.memory_space<vmem>>, vector<2x8x32xf32>,
    return
  }
  func.func @transform_0(%arg0: i32) -> (i32, i32, i32) {
    %c0_i32 = arith.constant 0 : i32
    %c0_i32_0 = arith.constant 0 : i32
    %c0_i32_1 = arith.constant 0 : i32
    return %arg0, %c0_i32, %c0_i32_0 : i32, i32, i32
  }
  func.func @transform_1(%arg0: i32) -> (i32, i32) {
    %c0_i32 = arith.constant 0 : i32
    %c0_i32_0 = arith.constant 0 : i32
    %c0_i32_1 = arith.constant 0 : i32
    return %c0_i32, %c0_i32_0 : i32, i32
  }
  func.func @transform_2(%arg0: i32) -> (i32, i32) {
    %c0_i32 = arith.constant 0 : i32
    %c0_i32_0 = arith.constant 0 : i32
    %c0_i32_1 = arith.constant 0 : i32
    return %c0_i32, %c0_i32_0 : i32, i32
  }
  func.func @transform_3(%arg0: i32) -> (i32, i32) {
    %c0_i32 = arith.constant 0 : i32
    %c0_i32_0 = arith.constant 0 : i32
    %c0_i32_1 = arith.constant 0 : i32
    return %c0_i32, %c0_i32_0 : i32, i32
  }
  func.func @transform_4(%arg0: i32) -> (i32, i32) {
    %c0_i32 = arith.constant 0 : i32
    %c0_i32_0 = arith.constant 0 : i32
    %c0_i32_1 = arith.constant 0 : i32
    return %c0_i32, %c0_i32_0 : i32, i32
  }
  func.func @transform_5(%arg0: i32) -> (i32, i32) {
    %c0_i32 = arith.constant 0 : i32
    %c0_i32_0 = arith.constant 0 : i32
    %c0_i32_1 = arith.constant 0 : i32
    return %c0_i32, %c0_i32_0 : i32, i32
  }
  func.func @transform_6(%arg0: i32) -> (i32, i32) {
    %c0_i32 = arith.constant 0 : i32
    %c0_i32_0 = arith.constant 0 : i32
    %c0_i32_1 = arith.constant 0 : i32
    return %c0_i32, %c0_i32_0 : i32, i32
  }
  func.func @transform_7(%arg0: i32) -> (i32, i32, i32) {
    %c0_i32 = arith.constant 0 : i32
    %c0_i32_0 = arith.constant 0 : i32
    %c0_i32_1 = arith.constant 0 : i32
    return %arg0, %c0_i32, %c0_i32_0 : i32, i32, i32
  }
}

</mosaic_0001>

<bundles_post_ra>
// kernel: tpu_custom_call.1
= control target key start
LH: loop header
LB: loop body
LE: loop exit
PB: predicated region body
PF: predicated region fallthrough
CT: control target
= control target key end

     0   :  { %vm35_vm0 = vcmask 261120   ;;  %s2674_s0 = inlined_call_operand.vmem [shape: f32[2,8,32], index: 0, kind: input, shape index: {}]   ;;  %s2675_s1 = inlined_call_operand.vmem [shape: f32[32,96], index: 1, kind: input, shape index: {}]   ;;  %s2676_s2 = inlined_call_operand.vmem [shape: f32[32,32], index: 2, kind: input, shape index: {}]   ;;  %s2677_s3 = inlined_call_operand.vmem [shape: f32[32,128], index: 3, kind: input, shape index: {}]   ;;  %s2678_s4 = inlined_call_operand.vmem [shape: f32[1,128], index: 4, kind: input, shape index: {}]   ;;  %s2679_s5 = inlined_call_operand.vmem [shape: f32[128,32], index: 5, kind: input, shape index: {}]   ;;  %s2680_s6 = inlined_call_operand.vmem [shape: f32[6,32], index: 6, kind: input, shape index: {}]   ;;  %s2681_s7 = inlined_call_operand.hbm [shape: f32[2,8,32], index: 7, kind: output, shape index: {}]  }
   0x1   :  { %v27_v0 = vld [vmem:[%s2674_s0] sm:$0xff] }
   0x2   :  { %v36_v1 = vsel %vm35_vm0, %v27_v0, 0.0 }
   0x3   :  { %37 = vadd.xlane.f32.xlu0 %v36_v1 }
   0x4   :  { %12 = vsyncpa [#allocation3], 0  ;;  %v28_v2 = vld [vmem:[%s2674_s0 + $0x8] sm:$0xff]  ;;  %v1940_v4 = vmov 32.0   ;;  %v96_v21 = vld [vmem:[%s2675_s1 + $0x18] sm:$0xff]  ;;  %s1941_s16 = smov 104  }
   0x5   :  { %v39_v3 = vsel %vm35_vm0, %v28_v2, 0.0  ;;  %1870 = vrcp.f32 %v1940_v4  ;;  %115 = vmatpush.msra.mxu0 %v96_v21  ;;  %v95_v22 = vld [vmem:[%s2675_s1 + $0x10] sm:$0xff]  ;;  %v94_v23 = vld [vmem:[%s2675_s1 + $0x8] sm:$0xff]  ;;  %v93_v24 = vld [vmem:[%s2675_s1] sm:$0xff]  ;;  %s1942_s17 = smov 120   ;;  %s1943_s18 = smov 112  }
   0x6   :  { %v1863_v39 = vld [vmem:[%s2680_s6] ss:$0 sm:$0xff]  ;;  %v1864_v43 = vld [vmem:[%s2680_s6 + $0x1] ss:$0 sm:$0xff]  ;;  %s1944_s19 = smov 96   ;;  %vm147_vm8 = vcmask 1047556  }
   0x7   :  { %116 = vmatpush.msra.mxu0 %v95_v22  ;;  %v1945_v57 = vmov 1983009808   ;;  %v1946_v1 = vmov 1934713408   ;;  %s1947_s20 = smov 64   ;;  %vm855_vm9 = vcmask 64512  }
   0x8   :  { %v152_v58 = vunpack.c.l.s4 %v1945_v57  ;;  %s1948_s21 = smov 16   ;;  %s1949_s22 = smov 24   ;;  %vm1605_vm11 = vcmask 130048   ;;  %vm1608_vm12 = vcmask 195584  }
   0x9   :  { %117 = vmatpush.msra.mxu0 %v94_v23  ;;  %s1950_s23 = smov 8   ;;  %s1788_s10 = sshll.u32 %s2681_s7, 4  ;;  %s1789_s10 = int_to_ptr.hbm [resolvable:$true] %s1788_s10 }
   0xa   :  { %v2052_v62 = vunpack.c.0.s8 %v152_v58  ;;  %s1951_s11 = smov [#allocation2]  }
   0xb   :  { %40 = vadd.xlane.f32.xlu0 %v39_v3  ;;  %v1871_v5 = vpop.eup %1870  ;;  %118 = vmatpush.msra.mxu0 %v93_v24  ;;  %s1786_s12 = sshll.u32 %s1951_s11, 4  ;;  %s1787_s12 = int_to_ptr.vmem [resolvable:$true] %s1786_s12 }
   0xc   :  { %v43_v6 = vmul.f32 32.0, %v1871_v5  ;;  %vm47_vm1 = vweird.f32 %v1871_v5 }
   0xe   :  { %v44_v7 = vsub.f32 1.0, %v43_v6 }
  0x10   :  { %v45_v8 = vmul.f32 %v1871_v5, %v44_v7 }
  0x12   :  { %v46_v9 = vadd.f32 %v1871_v5, %v45_v8 }
  0x14   :  { %v2001_v10 = vsel %vm47_vm1, %v1871_v5, %v46_v9 }
  0x76   :  { %v38_v11 = vpop.xlane.xlu0 %37 }
  0x77   :  { %v49_v12 = vmul.f32 %v2001_v10, %v38_v11 }
  0x79   :  { %v51_v13 = vsub.f32 %v27_v0, %v49_v12 }
  0x7b   :  { %v53_v14 = vmul.f32 %v51_v13, %v51_v13 }
  0x7d   :  { %v55_v15 = vsel %vm35_vm0, %v53_v14, 0.0 }
  0x7e   :  { %56 = vadd.xlane.f32.xlu1 %v55_v15  ;;  %v41_v16 = vpop.xlane.xlu0 %40 }
  0x7f   :  { %v50_v17 = vmul.f32 %v2001_v10, %v41_v16 }
  0x81   :  { %v52_v18 = vsub.f32 %v28_v2, %v50_v17  ;;  %v176_v2 = vunpack.c.l.s4 %v1946_v1 }
  0x83   :  { %v54_v19 = vmul.f32 %v52_v18, %v52_v18  ;;  %v2068_v12 = vunpack.c.0.s8 %v176_v2 }
  0x85   :  { %v58_v20 = vsel %vm35_vm0, %v54_v19, 0.0 }
  0x86   :  { %59 = vadd.xlane.f32.xlu1 %v58_v20 }
  0xf1   :  { %v57_v25 = vpop.xlane.xlu1 %56 }
  0xf2   :  { %v61_v26 = vmul.f32 %v57_v25, %v2001_v10 }
  0xf4   :  { %v63_v27 = vadd.f32 1e-05, %v61_v26 }
  0xf6   :  { %1872 = vrsqrt.f32 %v63_v27  ;;  %vm71_vm3 = vweird.f32 %v63_v27 }
  0xf9   :  { %v60_v28 = vpop.xlane.xlu1 %59 }
  0xfa   :  { %v62_v29 = vmul.f32 %v60_v28, %v2001_v10 }
  0xfc   :  { %v1873_v30 = vpop.eup %1872  ;;  %v64_v31 = vadd.f32 1e-05, %v62_v29 }
  0xfd   :  { %v66_v32 = vmul.f32 %v1873_v30, %v63_v27  ;;  %vm72_vm2 = vweird.f32 %v1873_v30 }
  0xfe   :  { %1874 = vrsqrt.f32 %v64_v31  ;;  %vm73_vm4 = vmor %vm71_vm3, %vm72_vm2  ;;  %vm81_vm5 = vweird.f32 %v64_v31 }
  0xff   :  { %v67_v33 = vmul.f32 %v1873_v30, %v66_v32 }
 0x101   :  { %v68_v34 = vmul.f32 0.5, %v67_v33 }
 0x103   :  { %v69_v35 = vsub.f32 1.5, %v68_v34 }
 0x104   :  { %v1875_v36 = vpop.eup %1874 }
 0x105   :  { %v70_v37 = vmul.f32 %v1873_v30, %v69_v35  ;;  %v76_v38 = vmul.f32 %v1875_v36, %v64_v31  ;;  %vm82_vm6 = vweird.f32 %v1875_v36 }
 0x106   :  { %vm83_vm7 = vmor %vm81_vm5, %vm82_vm6 }
 0x107   :  { %v74_v40 = vsel %vm73_vm4, %v1873_v30, %v70_v37  ;;  %v77_v41 = vmul.f32 %v1875_v36, %v76_v38 }
 0x108   :  { %v85_v42 = vmul.f32 %v74_v40, %v51_v13 }
 0x109   :  { %v78_v44 = vmul.f32 0.5, %v77_v41 }
 0x10a   :  { %v88_v45 = vmul.f32 %v1863_v39, %v85_v42 }
 0x10b   :  { %v79_v46 = vsub.f32 1.5, %v78_v44 }
 0x10c   :  { %v91_v47 = vadd.f32 %v1864_v43, %v88_v45 }
 0x10d   :  { %v80_v48 = vmul.f32 %v1875_v36, %v79_v46 }
 0x10e   :  { %1800 = vmatmul.msk.f32.vlgmr.msra.gmra.mxu0 %vm35_vm0, %v91_v47 }
 0x10f   :  { %v84_v49 = vsel %vm83_vm7, %v1875_v36, %v80_v48 }
 0x110   :  { %v86_v50 = vmul.f32 %v84_v49, %v52_v18 }
 0x112   :  { %v89_v51 = vmul.f32 %v1863_v39, %v86_v50 }
 0x114   :  { %v92_v52 = vadd.f32 %v1864_v43, %v89_v51 }
 0x116   :  { %1801 = vmatmul.msk.f32.gmra.mxu0 %vm35_vm0, %v92_v52 }
 0x18b   :  { %v2029_v53 = vpop.f32.mrf.mxu0 }
 0x18c   :  { %140 = vrot.lane.b32.xlu0 %v2029_v53, %s1941_s16  ;;  %128 = vrot.lane.b32.xlu2 %v2029_v53, %s1942_s17  ;;  %v149_v61 = vrot.slane %v2029_v53, 4 }
 0x193   :  { %v2033_v54 = vpop.f32.mrf.mxu0 }
 0x194   :  { %134 = vrot.lane.b32.xlu2 %v2029_v53, %s1943_s18  ;;  %130 = vrot.lane.b32.xlu1 %v2033_v54, %s1942_s17  ;;  %v205_v7 = vrot.slane %v2033_v54, 4 }
 0x19c   :  { %136 = vrot.lane.b32.xlu2 %v2033_v54, %s1943_s18 }
 0x1a4   :  { %142 = vrot.lane.b32.xlu2 %v2033_v54, %s1941_s16 }
 0x1ac   :  { %367 = vrot.lane.b32.xlu2 %v2029_v53, %s1944_s19 }
 0x1e6   :  { %v129_v55 = vpop.permute.xlu2 %128 }
 0x1e7   :  { %371 = vrot.lane.b32.xlu0 %v129_v55, %s1944_s19  ;;  %v161_v4 = vrot.slane %v129_v55, 4  ;;  %v1843_v33 = vpack.i.bf16 %v129_v55, %v2029_v53 }
 0x1ee   :  { %v2042_v56 = vpop.permute.xlu2 %134 }
 0x1ef   :  { %369 = vrot.lane.b32.xlu0 %v2033_v54, %s1944_s19  ;;  %375 = vrot.lane.b32.xlu2 %v2042_v56, %s1944_s19  ;;  %v146_v59 = vrot.slane %v2042_v56, 4  ;;  %v150_v63 = vsel %vm147_vm8, %v2042_v56, %v149_v61 }
 0x1f0   :  { %v158_v3 = vperm.slane %v150_v63, %v2052_v62 }
 0x1f1   :  { %v148_v0 = vsel %vm147_vm8, %v146_v59, %v2029_v53 }
 0x1f2   :  { %v154_v5 = vperm.slane %v148_v0, %v2052_v62  ;;  %v185_v15 = vrot.slane %v158_v3, 4 }
 0x1f4   :  { %v173_v18 = vrot.slane %v154_v5, 4 }
 0x1f6   :  { %v2049_v60 = vpop.permute.xlu2 %136 }
 0x1f7   :  { %v203_v6 = vrot.slane %v2049_v60, 4  ;;  %v206_v11 = vsel %vm147_vm8, %v2049_v60, %v205_v7 }
 0x1f8   :  { %v214_v21 = vperm.slane %v206_v11, %v2052_v62 }
 0x1f9   :  { %v204_v19 = vsel %vm147_vm8, %v203_v6, %v2033_v54 }
 0x1fa   :  { %v210_v26 = vperm.slane %v204_v19, %v2052_v62  ;;  %v241_v34 = vrot.slane %v214_v21, 4 }
 0x1fc   :  { %v229_v42 = vrot.slane %v210_v26, 4 }
 0x1fe   :  { %v2062_v8 = vpop.permute.xlu2 %142  ;;  %v2064_v9 = vpop.permute.xlu0 %140 }
 0x1ff   :  { %v159_v13 = vrot.slane %v2064_v9, 4  ;;  %v162_v14 = vsel %vm147_vm8, %v2064_v9, %v161_v4  ;;  %381 = vrot.lane.b32.xlu0 %v2062_v8, %s1944_s19  ;;  %379 = vrot.lane.b32.xlu1 %v2064_v9, %s1944_s19  ;;  %v1858_v17 = vpack.i.bf16 %v2062_v8, %v2049_v60  ;;  %v215_v35 = vrot.slane %v2062_v8, 4 }
 0x200   :  { %v170_v16 = vperm.slane %v162_v14, %v2052_v62 }
 0x201   :  { %v160_v20 = vsel %vm147_vm8, %v159_v13, %v129_v55 }
 0x202   :  { %v166_v22 = vperm.slane %v160_v20, %v2052_v62  ;;  %v183_v23 = vrot.slane %v170_v16, 4  ;;  %v186_v24 = vsel %vm147_vm8, %v170_v16, %v185_v15 }
 0x203   :  { %v194_v25 = vperm.slane %v186_v24, %v2068_v12 }
 0x204   :  { %v171_v27 = vrot.slane %v166_v22, 4  ;;  %v174_v28 = vsel %vm147_vm8, %v166_v22, %v173_v18  ;;  %v184_v29 = vsel %vm147_vm8, %v183_v23, %v158_v3 }
 0x205   :  { %v182_v30 = vperm.slane %v174_v28, %v2068_v12  ;;  %v190_v31 = vperm.slane %v184_v29, %v2068_v12  ;;  %v201_v32 = vrot.slane %v194_v25, 4 }
 0x206   :  { %v172_v36 = vsel %vm147_vm8, %v171_v27, %v154_v5  ;;  %v2095_v37 = vpop.permute.xlu1 %130 }
 0x207   :  { %v178_v38 = vperm.slane %v172_v36, %v2068_v12  ;;  %v197_v39 = vrot.slane %v182_v30, 4  ;;  %v199_v40 = vrot.slane %v190_v31, 4  ;;  %v202_v41 = vsel %vm147_vm8, 0.0, %v201_v32  ;;  %1844 = vrot.lane.b32.xlu0 %v1843_v33, %s1947_s20  ;;  %373 = vrot.lane.b32.xlu2 %v2095_v37, %s1944_s19 }
 0x208   :  { %v275_v43 = vrot.slane %v202_v41, 4  ;;  %v216_v44 = vsel %vm147_vm8, %v215_v35, %v2095_v37  ;;  %v217_v45 = vrot.slane %v2095_v37, 4  ;;  %377 = vrot.lane.b32.xlu1 %v2049_v60, %s1944_s19  ;;  %v270_v53 = vsel %vm147_vm8, %v201_v32, %v190_v31 }
 0x209   :  { %v222_v46 = vperm.slane %v216_v44, %v2052_v62  ;;  %v195_v47 = vrot.slane %v178_v38, 4  ;;  %v198_v48 = vsel %vm147_vm8, 0.0, %v197_v39  ;;  %v200_v49 = vsel %vm147_vm8, 0.0, %v199_v40 }
 0x20a   :  { %v218_v50 = vsel %vm147_vm8, %v2062_v8, %v217_v45  ;;  %v259_v51 = vsel %vm147_vm8, %v197_v39, %v178_v38  ;;  %v264_v52 = vrot.slane %v198_v48, 4  ;;  %v274_v1 = vperm.slane %v270_v53, %v2052_v62 }
 0x20b   :  { %v226_v55 = vperm.slane %v218_v50, %v2052_v62  ;;  %v227_v57 = vrot.slane %v222_v46, 4  ;;  %v230_v58 = vsel %vm147_vm8, %v222_v46, %v229_v42  ;;  %v196_v59 = vsel %vm147_vm8, 0.0, %v195_v47 }
 0x20c   :  { %v238_v61 = vperm.slane %v230_v58, %v2068_v12  ;;  %v263_v63 = vperm.slane %v259_v51, %v2052_v62  ;;  %v265_v0 = vsel %vm147_vm8, %v264_v52, %v196_v59  ;;  %v276_v13 = vsel %vm147_vm8, %v275_v43, %v200_v49 }
 0x20d   :  { %v228_v2 = vsel %vm147_vm8, %v227_v57, %v210_v26  ;;  %v239_v3 = vrot.slane %v226_v55, 4  ;;  %v242_v4 = vsel %vm147_vm8, %v226_v55, %v241_v34  ;;  %v269_v5 = vperm.slane %v265_v0, %v2052_v62 }
 0x20e   :  { %v234_v6 = vperm.slane %v228_v2, %v2068_v12  ;;  %v250_v7 = vperm.slane %v242_v4, %v2068_v12  ;;  %v253_v11 = vrot.slane %v238_v61, 4  ;;  %v280_v15 = vperm.slane %v276_v13, %v2052_v62 }
 0x20f   :  { %v240_v14 = vsel %vm147_vm8, %v239_v3, %v214_v21  ;;  %v283_v16 = vrot.slane %v263_v63, 4  ;;  %v295_v18 = vrot.slane %v274_v1, 4  ;;  %v281_v27 = vrot.slane %v269_v5, 4 }
 0x210   :  { %v246_v19 = vperm.slane %v240_v14, %v2068_v12  ;;  %v251_v20 = vrot.slane %v234_v6, 4  ;;  %v254_v22 = vsel %vm147_vm8, 0.0, %v253_v11  ;;  %v257_v23 = vrot.slane %v250_v7, 4 }
 0x211   :  { %v318_v24 = vrot.slane %v254_v22, 4  ;;  %v284_v25 = vsel %vm147_vm8, %v269_v5, %v283_v16  ;;  %v296_v26 = vsel %vm147_vm8, %v280_v15, %v295_v18  ;;  %v282_v32 = vsel %vm147_vm8, %v281_v27, %v263_v63  ;;  %v368_v22 = vpop.permute.xlu2 %367 }
 0x212   :  { %v252_v28 = vsel %vm147_vm8, 0.0, %v251_v20  ;;  %v258_v21 = vsel %vm147_vm8, 0.0, %v257_v23  ;;  %v292_v29 = vperm.slane %v284_v25, %v2068_v12  ;;  %v304_v30 = vperm.slane %v296_v26, %v2068_v12 }
 0x213   :  { %v329_v31 = vrot.slane %v258_v21, 4  ;;  %v293_v33 = vrot.slane %v280_v15, 4  ;;  %v255_v34 = vrot.slane %v246_v19, 4  ;;  %v288_v38 = vperm.slane %v282_v32, %v2068_v12 }
 0x214   :  { %v309_v35 = vrot.slane %v304_v30, 4  ;;  %v311_v36 = vrot.slane %v292_v29, 4  ;;  %v313_v39 = vsel %vm147_vm8, %v253_v11, %v234_v6  ;;  %v319_v43 = vsel %vm147_vm8, %v318_v24, %v252_v28 }
 0x215   :  { %v294_v40 = vsel %vm147_vm8, %v293_v33, %v274_v1  ;;  %v256_v41 = vsel %vm147_vm8, 0.0, %v255_v34  ;;  %v317_v42 = vperm.slane %v313_v39, %v2052_v62  ;;  %v307_v46 = vrot.slane %v288_v38, 4 }
 0x216   :  { %v2145_v44 = vsel %vm147_vm8, %v309_v35, %v292_v29  ;;  %v300_v45 = vperm.slane %v294_v40, %v2068_v12  ;;  %v323_v47 = vperm.slane %v319_v43, %v2052_v62  ;;  %v324_v48 = vsel %vm147_vm8, %v257_v23, %v246_v19 }
 0x217   :  { %v330_v49 = vsel %vm147_vm8, %v329_v31, %v256_v41  ;;  %v2152_v50 = vsel %vm147_vm8, %v304_v30, %v311_v36  ;;  %v337_v51 = vrot.slane %v317_v42, 4  ;;  %v328_v55 = vperm.slane %v324_v48, %v2052_v62 }
 0x218   :  { %v305_v52 = vrot.slane %v300_v45, 4  ;;  %v2155_v53 = vsel %vm147_vm8, %v300_v45, %v307_v46  ;;  %v334_v57 = vperm.slane %v330_v49, %v2052_v62  ;;  %v335_v58 = vrot.slane %v323_v47, 4 }
 0x219   :  { %v338_v59 = vsel %vm147_vm8, %v323_v47, %v337_v51  ;;  %v349_v0 = vrot.slane %v328_v55, 4  ;;  %v393_v27 = vrot.slane %v368_v22, 4 }
 0x21a   :  { %v2161_v61 = vsel %vm147_vm8, %v305_v52, %v288_v38  ;;  %v347_v63 = vrot.slane %v334_v57, 4  ;;  %v346_v1 = vperm.slane %v338_v59, %v2068_v12  ;;  %v336_v2 = vsel %vm147_vm8, %v335_v58, %v317_v42 }
 0x21b   :  { %v342_v3 = vperm.slane %v336_v2, %v2068_v12  ;;  %v350_v5 = vsel %vm147_vm8, %v334_v57, %v349_v0 }
 0x21c   :  { %v348_v4 = vsel %vm147_vm8, %v347_v63, %v328_v55  ;;  %v365_v6 = vrot.slane %v346_v1, 4  ;;  %v358_v11 = vperm.slane %v350_v5, %v2068_v12 }
 0x21d   :  { %v354_v7 = vperm.slane %v348_v4, %v2068_v12  ;;  %v361_v13 = vrot.slane %v342_v3, 4 }
 0x21e   :  { %v363_v15 = vrot.slane %v358_v11, 4  ;;  %v2171_v16 = vsel %vm147_vm8, %v358_v11, %v365_v6 }
 0x21f   :  { %v359_v14 = vrot.slane %v354_v7, 4  ;;  %v2174_v18 = vsel %vm147_vm8, %v354_v7, %v361_v13 }
 0x220   :  { %v2177_v19 = vsel %vm147_vm8, %v363_v15, %v346_v1 }
 0x221   :  { %v2180_v20 = vsel %vm147_vm8, %v359_v14, %v342_v3 }
 0x249   :  { %v376_v24 = vpop.permute.xlu2 %375 }
 0x24a   :  { %v391_v25 = vrot.slane %v376_v24, 4  ;;  %v394_v28 = vsel %vm147_vm8, %v376_v24, %v393_v27 }
 0x24b   :  { %v402_v29 = vperm.slane %v394_v28, %v2052_v62 }
 0x24c   :  { %v392_v21 = vsel %vm147_vm8, %v391_v25, %v368_v22 }
 0x24d   :  { %v398_v31 = vperm.slane %v392_v21, %v2052_v62  ;;  %v429_v40 = vrot.slane %v402_v29, 4 }
 0x24f   :  { %v417_v42 = vrot.slane %v398_v31, 4 }
 0x259   :  { %v372_v23 = vpop.permute.xlu0 %371 }
 0x25a   :  { %v405_v32 = vrot.slane %v372_v23, 4 }
 0x261   :  { %v370_v26 = vpop.permute.xlu0 %369  ;;  %v374_v30 = vpop.permute.xlu2 %373 }
 0x262   :  { %v461_v35 = vrot.slane %v374_v30, 4  ;;  %v449_v2 = vrot.slane %v370_v26, 4 }
 0x271   :  { %v380_v33 = vpop.permute.xlu1 %379  ;;  %v382_v34 = vpop.permute.xlu0 %381 }
 0x272   :  { %v403_v36 = vrot.slane %v380_v33, 4  ;;  %v406_v38 = vsel %vm147_vm8, %v380_v33, %v405_v32  ;;  %v459_v39 = vrot.slane %v382_v34, 4  ;;  %v462_v45 = vsel %vm147_vm8, %v382_v34, %v461_v35 }
 0x273   :  { %v414_v41 = vperm.slane %v406_v38, %v2052_v62  ;;  %v470_v58 = vperm.slane %v462_v45, %v2052_v62 }
 0x274   :  { %v404_v43 = vsel %vm147_vm8, %v403_v36, %v372_v23  ;;  %v460_v49 = vsel %vm147_vm8, %v459_v39, %v374_v30 }
 0x275   :  { %v410_v46 = vperm.slane %v404_v43, %v2052_v62  ;;  %v427_v47 = vrot.slane %v414_v41, 4  ;;  %v430_v48 = vsel %vm147_vm8, %v414_v41, %v429_v40  ;;  %v466_v1 = vperm.slane %v460_v49, %v2052_v62 }
 0x276   :  { %v438_v51 = vperm.slane %v430_v48, %v2068_v12  ;;  %v483_v24 = vrot.slane %v470_v58, 4 }
 0x277   :  { %v415_v52 = vrot.slane %v410_v46, 4  ;;  %v418_v55 = vsel %vm147_vm8, %v410_v46, %v417_v42  ;;  %v428_v57 = vsel %vm147_vm8, %v427_v47, %v402_v29  ;;  %v471_v23 = vrot.slane %v466_v1, 4 }
 0x278   :  { %v426_v59 = vperm.slane %v418_v55, %v2068_v12  ;;  %v434_v63 = vperm.slane %v428_v57, %v2068_v12  ;;  %v445_v0 = vrot.slane %v438_v51, 4 }
 0x279   :  { %v416_v3 = vsel %vm147_vm8, %v415_v52, %v398_v31 }
 0x27a   :  { %v422_v4 = vperm.slane %v416_v3, %v2068_v12  ;;  %v441_v5 = vrot.slane %v426_v59, 4  ;;  %v446_v6 = vsel %vm147_vm8, 0.0, %v445_v0  ;;  %v378_v7 = vpop.permute.xlu1 %377  ;;  %v443_v11 = vrot.slane %v434_v63, 4 }
 0x27b   :  { %v514_v13 = vsel %vm147_vm8, %v445_v0, %v434_v63  ;;  %v447_v14 = vrot.slane %v378_v7, 4  ;;  %v450_v15 = vsel %vm147_vm8, %v378_v7, %v449_v2  ;;  %v519_v21 = vrot.slane %v446_v6, 4 }
 0x27c   :  { %v442_v22 = vsel %vm147_vm8, 0.0, %v441_v5  ;;  %v458_v25 = vperm.slane %v450_v15, %v2052_v62  ;;  %v518_v28 = vperm.slane %v514_v13, %v2052_v62  ;;  %v439_v33 = vrot.slane %v422_v4, 4 }
 0x27d   :  { %v508_v27 = vrot.slane %v442_v22, 4  ;;  %v448_v29 = vsel %vm147_vm8, %v447_v14, %v370_v26  ;;  %v444_v34 = vsel %vm147_vm8, 0.0, %v443_v11  ;;  %v503_v36 = vsel %vm147_vm8, %v441_v5, %v422_v4 }
 0x27e   :  { %v454_v30 = vperm.slane %v448_v29, %v2052_v62  ;;  %v484_v31 = vsel %vm147_vm8, %v483_v24, %v458_v25  ;;  %v485_v32 = vrot.slane %v458_v25, 4  ;;  %v440_v41 = vsel %vm147_vm8, 0.0, %v439_v33 }
 0x27f   :  { %v490_v35 = vperm.slane %v484_v31, %v2068_v12  ;;  %v507_v45 = vperm.slane %v503_v36, %v2052_v62  ;;  %v509_v47 = vsel %vm147_vm8, %v508_v27, %v440_v41  ;;  %v520_v48 = vsel %vm147_vm8, %v519_v21, %v444_v34 }
 0x280   :  { %v472_v38 = vsel %vm147_vm8, %v471_v23, %v454_v30  ;;  %v473_v39 = vrot.slane %v454_v30, 4  ;;  %v486_v40 = vsel %vm147_vm8, %v470_v58, %v485_v32  ;;  %v539_v49 = vrot.slane %v518_v28, 4 }
 0x281   :  { %v478_v26 = vperm.slane %v472_v38, %v2068_v12  ;;  %v494_v42 = vperm.slane %v486_v40, %v2068_v12  ;;  %v499_v43 = vrot.slane %v490_v35, 4  ;;  %v513_v57 = vperm.slane %v509_v47, %v2052_v62 }
 0x282   :  { %v474_v46 = vsel %vm147_vm8, %v466_v1, %v473_v39  ;;  %v524_v58 = vperm.slane %v520_v48, %v2052_v62  ;;  %v527_v59 = vrot.slane %v507_v45, 4 }
 0x283   :  { %v482_v51 = vperm.slane %v474_v46, %v2068_v12  ;;  %v501_v52 = vrot.slane %v494_v42, 4  ;;  %v495_v55 = vrot.slane %v478_v26, 4  ;;  %v500_v0 = vsel %vm147_vm8, 0.0, %v499_v43 }
 0x284   :  { %v528_v5 = vsel %vm147_vm8, %v513_v57, %v527_v59  ;;  %v540_v6 = vsel %vm147_vm8, %v524_v58, %v539_v49  ;;  %v525_v14 = vrot.slane %v513_v57, 4  ;;  %v537_v24 = vrot.slane %v524_v58, 4 }
 0x285   :  { %v497_v63 = vrot.slane %v482_v51, 4  ;;  %v502_v1 = vsel %vm147_vm8, 0.0, %v501_v52  ;;  %v568_v2 = vsel %vm147_vm8, %v501_v52, %v490_v35  ;;  %v536_v11 = vperm.slane %v528_v5, %v2068_v12 }
 0x286   :  { %v572_v3 = vperm.slane %v568_v2, %v2052_v62  ;;  %v573_v4 = vrot.slane %v502_v1, 4  ;;  %v548_v13 = vperm.slane %v540_v6, %v2068_v12  ;;  %v496_v25 = vsel %vm147_vm8, 0.0, %v495_v55 }
 0x287   :  { %v498_v7 = vsel %vm147_vm8, 0.0, %v497_v63  ;;  %v526_v29 = vsel %vm147_vm8, %v525_v14, %v507_v45  ;;  %v538_v31 = vsel %vm147_vm8, %v537_v24, %v518_v28  ;;  %v557_v32 = vsel %vm147_vm8, %v497_v63, %v478_v26 }
 0x288   :  { %v562_v15 = vrot.slane %v498_v7, 4  ;;  %v574_v22 = vsel %vm147_vm8, %v573_v4, %v500_v0  ;;  %v593_v23 = vrot.slane %v572_v3, 4  ;;  %v553_v21 = vrot.slane %v548_v13, 4 }
 0x289   :  { %v578_v27 = vperm.slane %v574_v22, %v2052_v62  ;;  %v532_v30 = vperm.slane %v526_v29, %v2068_v12  ;;  %v544_v36 = vperm.slane %v538_v31, %v2068_v12  ;;  %v561_v39 = vperm.slane %v557_v32, %v2052_v62 }
 0x28a   :  { %v563_v33 = vsel %vm147_vm8, %v562_v15, %v496_v25  ;;  %v554_v35 = vsel %vm147_vm8, %v553_v21, %v536_v11  ;;  %v555_v47 = vrot.slane %v536_v11, 4 }
 0x28b   :  { %v591_v34 = vrot.slane %v578_v27, 4  ;;  %1806 = vmatpush.xpose.msk.msra.mxu3 %vm855_vm9, %v554_v35  ;;  %v551_v38 = vrot.slane %v532_v30, 4  ;;  %v567_v40 = vperm.slane %v563_v33, %v2052_v62  ;;  %v594_v41 = vsel %vm147_vm8, %v578_v27, %v593_v23 }
 0x28c   :  { %v549_v42 = vrot.slane %v544_v36, 4  ;;  %v581_v45 = vrot.slane %v561_v39, 4  ;;  %v602_v46 = vperm.slane %v594_v41, %v2068_v12 }
 0x28d   :  { %v592_v28 = vsel %vm147_vm8, %v591_v34, %v572_v3  ;;  %v552_v26 = vsel %vm147_vm8, %v544_v36, %v551_v38  ;;  %v579_v43 = vrot.slane %v567_v40, 4 }
 0x28e   :  { %v550_v48 = vsel %vm147_vm8, %v549_v42, %v532_v30  ;;  %1807 = vmatmul.msk.f32.vlgmr.msra.gmra.mxu3 %vm855_vm9, %v2145_v44  ;;  %v582_v51 = vsel %vm147_vm8, %v567_v40, %v581_v45  ;;  %v598_v55 = vperm.slane %v592_v28, %v2068_v12  ;;  %v607_v58 = vrot.slane %v602_v46, 4 }
 0x28f   :  { %1802 = vmatpush.xpose.msk.msra.mxu2 %vm855_vm9, %v550_v48  ;;  %v580_v49 = vsel %vm147_vm8, %v579_v43, %v561_v39  ;;  %v590_v57 = vperm.slane %v582_v51, %v2068_v12  ;;  %v556_v44 = vsel %vm147_vm8, %v548_v13, %v555_v47  ;;  %v1848_v45 = vpack.i.bf16 %v2064_v9, %v2042_v56  ;;  %v1845_v47 = vpop.permute.xlu0 %1844 }
 0x290   :  { %v586_v52 = vperm.slane %v580_v49, %v2068_v12  ;;  %v603_v63 = vrot.slane %v598_v55, 4 }
 0x291   :  { %v608_v1 = vsel %vm147_vm8, %v607_v58, %v590_v57 }
 0x292   :  { %1803 = vmatmul.msk.f32.vlgmr.msra.gmra.mxu2 %vm855_vm9, %v2161_v61  ;;  %v605_v59 = vrot.slane %v586_v52, 4  ;;  %v604_v2 = vsel %vm147_vm8, %v603_v63, %v586_v52  ;;  %v609_v61 = vrot.slane %v590_v57, 4 }
 0x293   :  { %1804 = vmatpush.xpose.msk.msrb.mxu2 %vm855_vm9, %v552_v26 }
 0x294   :  { %v606_v0 = vsel %vm147_vm8, %v598_v55, %v605_v59  ;;  %v610_v3 = vsel %vm147_vm8, %v602_v46, %v609_v61  ;;  %v1853_v46 = vpack.i.bf16 %v2095_v37, %v2033_v54 }
 0x295   :  { %1812 = vmatpush.xpose.msk.msrb.mxu3 %vm855_vm9, %v606_v0 }
 0x297   :  { %1808 = vmatpush.xpose.msk.msra.mxu2 %vm855_vm9, %v556_v44 }
 0x298   :  { %1813 = vmatmul.msk.f32.vlgmr.msrb.gmra.mxu3 %vm855_vm9, %v2174_v18 }
 0x299   :  { %1814 = vmatpush.xpose.msk.msra.mxu3 %vm855_vm9, %v608_v1 }
 0x29a   :  { %1805 = vmatmul.msk.f32.vlgmr.msrb.gmra.mxu2 %vm855_vm9, %v2155_v53  ;;  %v1072_v53 = vlaneseq }
 0x29b   :  { %1810 = vmatpush.xpose.msk.msrb.mxu2 %vm855_vm9, %v604_v2 }
 0x29c   :  { %v1073_v18 = vshrl.u32 %v1072_v53, 7  ;;  %v1075_v4 = vand.u32 127, %v1072_v53 }
 0x29e   :  { %vm2286_vm10 = vcmp.ge.s32.totalorder %v1073_v18, %v1075_v4  ;;  %v1846_v18 = vunpack.i.l.bf16 %v1845_v47 }
 0x2a0   :  { %1815 = vmatmul.msk.f32.vlgmr.msra.gmra.mxu3 %vm855_vm9, %v2177_v19 }
 0x2a2   :  { %1809 = vmatmul.msk.f32.vlgmr.msra.gmra.mxu2 %vm855_vm9, %v2152_v50 }
 0x2a3   :  { %1816 = vmatpush.xpose.msk.msra.mxu2 %vm855_vm9, %v610_v3  ;;  %v1847_v3 = vunpack.i.h.bf16 %v1845_v47 }
 0x2a5   :  { %v649_v4 = vrot.slane %v1847_v3, 4 }
 0x2aa   :  { %1811 = vmatmul.msk.f32.vlgmr.msrb.gmra.mxu2 %vm855_vm9, %v2180_v20 }
 0x2b2   :  { %1817 = vmatmul.msk.f32.vlgmr.msra.gmra.mxu2 %vm855_vm9, %v2171_v16 }
 0x311   :  { %v931_v5 = vpop.f32.mrf.mxu3 }
 0x312   :  { %v1066_v19 = vmul.f32 0.17677669, %v931_v5 }
 0x314   :  { %v1081_v50 = vsel %vm2286_vm10, %v1066_v19, -1e+30  ;;  %v637_v19 = vrot.slane %v1846_v18, 4 }
 0x315   :  { %v879_v7 = vpop.f32.mrf.mxu2  ;;  %v1093_v11 = vsel %vm855_vm9, %v1081_v50, -inf }
 0x316   :  { %v1064_v13 = vmul.f32 0.17677669, %v879_v7  ;;  %1094 = vmax.xlane.f32.xlu0 %v1093_v11 }
 0x318   :  { %v1079_v16 = vsel %vm2286_vm10, %v1064_v13, -1e+30 }
 0x319   :  { %v1087_v20 = vsel %vm855_vm9, %v1079_v16, -inf }
 0x31a   :  { %1088 = vmax.xlane.f32.xlu2 %v1087_v20 }
 0x31b   :  { %v1009_v14 = vpop.f32.mrf.mxu3 }
 0x31c   :  { %v1069_v15 = vmul.f32 0.17677669, %v1009_v14 }
 0x31d   :  { %v905_v22 = vpop.f32.mrf.mxu2 }
 0x31e   :  { %v1065_v23 = vmul.f32 0.17677669, %v905_v22  ;;  %v2298_v24 = vsel %vm2286_vm10, %v1069_v15, -1e+30 }
 0x31f   :  { %v1102_v25 = vsel %vm855_vm9, %v2298_v24, -inf }
 0x320   :  { %v1080_v27 = vsel %vm2286_vm10, %v1065_v23, -1e+30  ;;  %1103 = vmax.xlane.f32.xlu1 %v1102_v25 }
 0x321   :  { %v1090_v21 = vsel %vm855_vm9, %v1080_v27, -inf }
 0x322   :  { %1091 = vmax.xlane.f32.xlu2 %v1090_v21 }
 0x323   :  { %v1035_v29 = vpop.f32.mrf.mxu3 }
 0x324   :  { %v1070_v30 = vmul.f32 0.17677669, %v1035_v29 }
 0x325   :  { %v957_v31 = vpop.f32.mrf.mxu2 }
 0x326   :  { %v1067_v32 = vmul.f32 0.17677669, %v957_v31  ;;  %v1085_v33 = vsel %vm2286_vm10, %v1070_v30, -1e+30 }
 0x327   :  { %v1105_v34 = vsel %vm855_vm9, %v1085_v33, -inf }
 0x328   :  { %v1082_v35 = vsel %vm2286_vm10, %v1067_v32, -1e+30 }
 0x329   :  { %v1096_v36 = vsel %vm855_vm9, %v1082_v35, -inf }
 0x32a   :  { %1097 = vmax.xlane.f32.xlu1 %v1096_v36  ;;  %1106 = vmax.xlane.f32.xlu2 %v1105_v34 }
 0x32d   :  { %v983_v38 = vpop.f32.mrf.mxu2 }
 0x32e   :  { %v1068_v39 = vmul.f32 0.17677669, %v983_v38 }
 0x330   :  { %v1083_v40 = vsel %vm2286_vm10, %v1068_v39, -1e+30 }
 0x331   :  { %v1099_v41 = vsel %vm855_vm9, %v1083_v40, -inf }
 0x332   :  { %1100 = vmax.xlane.f32.xlu1 %v1099_v41 }
 0x335   :  { %v1061_v42 = vpop.f32.mrf.mxu2 }
 0x336   :  { %v1071_v28 = vmul.f32 0.17677669, %v1061_v42 }
 0x338   :  { %v2316_v26 = vsel %vm2286_vm10, %v1071_v28, -1e+30 }
 0x339   :  { %v1108_v43 = vsel %vm855_vm9, %v2316_v26, -inf }
 0x33a   :  { %1109 = vmax.xlane.f32.xlu0 %v1108_v43 }
 0x342   :  { %1849 = vrot.lane.b32.xlu2 %v1848_v45, %s1947_s20 }
 0x34b   :  { %1854 = vrot.lane.b32.xlu1 %v1853_v46, %s1947_s20 }
 0x34e   :  { %1859 = vrot.lane.b32.xlu0 %v1858_v17, %s1947_s20 }
 0x389   :  { %v1095_v48 = vpop.xlane.xlu0 %1094 }
 0x38a   :  { %v1113_v49 = vsub.f32 %v1081_v50, %v1095_v48 }
 0x38c   :  { %v1123_v51 = vmul.f32 1.442695, %v1113_v49 }
 0x38d   :  { %v1089_v52 = vpop.xlane.xlu2 %1088 }
 0x38e   :  { %1876 = vpow2.f32 %v1123_v51  ;;  %v1111_v55 = vsub.f32 %v1079_v16, %v1089_v52 }
 0x390   :  { %v1119_v56 = vmul.f32 1.442695, %v1111_v55 }
 0x392   :  { %1878 = vpow2.f32 %v1119_v56 }
 0x393   :  { %v1104_v9 = vpop.xlane.xlu1 %1103 }
 0x394   :  { %v2330_v57 = vpop.eup %1876  ;;  %v1116_v29 = vsub.f32 %v2298_v24, %v1104_v9 }
 0x395   :  { %v1092_v54 = vpop.xlane.xlu2 %1091  ;;  %v1141_v37 = vsel %vm855_vm9, %v2330_v57, 0.0 }
 0x396   :  { %v1112_v58 = vsub.f32 %v1080_v27, %v1092_v54  ;;  %1142 = vadd.xlane.f32.xlu1 %v1141_v37  ;;  %v1129_v42 = vmul.f32 1.442695, %v1116_v29 }
 0x398   :  { %v2334_v60 = vpop.eup %1878  ;;  %v1121_v8 = vmul.f32 1.442695, %v1112_v58 }
 0x399   :  { %v1135_v17 = vsel %vm855_vm9, %v2334_v60, 0.0 }
 0x39a   :  { %1880 = vpow2.f32 %v1121_v8  ;;  %1136 = vadd.xlane.f32.xlu2 %v1135_v17 }
 0x39d   :  { %v1098_v44 = vpop.xlane.xlu1 %1097  ;;  %v1107_v59 = vpop.xlane.xlu2 %1106 }
 0x39e   :  { %v1114_v63 = vsub.f32 %v1082_v35, %v1098_v44  ;;  %v1117_v0 = vsub.f32 %v1085_v33, %v1107_v59 }
 0x3a0   :  { %v2338_v1 = vpop.eup %1880  ;;  %v1125_v2 = vmul.f32 1.442695, %v1114_v63  ;;  %v1131_v61 = vmul.f32 1.442695, %v1117_v0 }
 0x3a1   :  { %v1138_v53 = vsel %vm855_vm9, %v2338_v1, 0.0 }
 0x3a2   :  { %1882 = vpow2.f32 %v1125_v2  ;;  %1139 = vadd.xlane.f32.xlu2 %v1138_v53 }
 0x3a3   :  { %1884 = vpow2.f32 %v1131_v61 }
 0x3a5   :  { %v1850_v5 = vpop.permute.xlu2 %1849  ;;  %v1101_v6 = vpop.xlane.xlu1 %1100 }
 0x3a6   :  { %v1852_v50 = vunpack.i.h.bf16 %v1850_v5  ;;  %v1851_v7 = vunpack.i.l.bf16 %v1850_v5  ;;  %v1115_v11 = vsub.f32 %v1083_v40, %v1101_v6 }
 0x3a8   :  { %v2342_v13 = vpop.eup %1882  ;;  %v647_v16 = vrot.slane %v1852_v50, 4  ;;  %v635_v20 = vrot.slane %v1851_v7, 4  ;;  %v638_v14 = vsel %vm147_vm8, %v1851_v7, %v637_v19  ;;  %v650_v15 = vsel %vm147_vm8, %v1852_v50, %v649_v4 }
 0x3a9   :  { %v2346_v22 = vpop.eup %1884  ;;  %v646_v23 = vperm.slane %v638_v14, %v2052_v62  ;;  %v658_v25 = vperm.slane %v650_v15, %v2052_v62  ;;  %v1127_v27 = vmul.f32 1.442695, %v1115_v11  ;;  %v1144_v21 = vsel %vm855_vm9, %v2342_v13, 0.0 }
 0x3aa   :  { %v636_v30 = vsel %vm147_vm8, %v635_v20, %v1846_v18  ;;  %v648_v31 = vsel %vm147_vm8, %v647_v16, %v1847_v3  ;;  %v1153_v32 = vsel %vm855_vm9, %v2346_v22, 0.0  ;;  %1145 = vadd.xlane.f32.xlu0 %v1144_v21 }
 0x3ab   :  { %v642_v33 = vperm.slane %v636_v30, %v2052_v62  ;;  %v654_v34 = vperm.slane %v648_v31, %v2052_v62  ;;  %v671_v35 = vrot.slane %v658_v25, 4  ;;  %v673_v36 = vrot.slane %v646_v23, 4  ;;  %1154 = vadd.xlane.f32.xlu2 %v1153_v32 }
 0x3ac   :  { %1886 = vpow2.f32 %v1127_v27 }
 0x3ad   :  { %v659_v38 = vrot.slane %v654_v34, 4  ;;  %v661_v39 = vrot.slane %v642_v33, 4  ;;  %v672_v24 = vsel %vm147_vm8, %v671_v35, %v646_v23  ;;  %v674_v40 = vsel %vm147_vm8, %v658_v25, %v673_v36  ;;  %v1110_v41 = vpop.xlane.xlu0 %1109 }
 0x3ae   :  { %v678_v28 = vperm.slane %v672_v24, %v2068_v12  ;;  %v682_v43 = vperm.slane %v674_v40, %v2068_v12  ;;  %v1118_v45 = vsub.f32 %v2316_v26, %v1110_v41  ;;  %1888 = vpow2.f32 %v1129_v42 }
 0x3af   :  { %v660_v46 = vsel %vm147_vm8, %v659_v38, %v642_v33  ;;  %v662_v47 = vsel %vm147_vm8, %v654_v34, %v661_v39 }
 0x3b0   :  { %v666_v48 = vperm.slane %v660_v46, %v2068_v12  ;;  %v670_v49 = vperm.slane %v662_v47, %v2068_v12  ;;  %v687_v51 = vrot.slane %v678_v28, 4  ;;  %v689_v52 = vrot.slane %v682_v43, 4 }
 0x3b1   :  { %v1133_v55 = vmul.f32 1.442695, %v1118_v45 }
 0x3b2   :  { %v2368_v56 = vpop.eup %1886  ;;  %v685_v9 = vrot.slane %v670_v49, 4  ;;  %v690_v54 = vsel %vm147_vm8, 0.0, %v689_v52  ;;  %v683_v37 = vrot.slane %v666_v48, 4  ;;  %v758_v8 = vsel %vm147_vm8, %v689_v52, %v678_v28 }
 0x3b3   :  { %v763_v58 = vrot.slane %v690_v54, 4  ;;  %1890 = vpow2.f32 %v1133_v55  ;;  %v1147_v26 = vsel %vm855_vm9, %v2368_v56, 0.0  ;;  %v688_v44 = vsel %vm147_vm8, 0.0, %v687_v51 }
 0x3b4   :  { %1148 = vadd.xlane.f32.xlu0 %v1147_v26  ;;  %v686_v17 = vsel %vm147_vm8, 0.0, %v685_v9  ;;  %v747_v59 = vsel %vm147_vm8, %v685_v9, %v666_v48  ;;  %v762_v63 = vperm.slane %v758_v8, %v2052_v62  ;;  %v684_v3 = vsel %vm147_vm8, 0.0, %v683_v37  ;;  %v2383_v6 = vpop.eup %1888 }
 0x3b5   :  { %v751_v0 = vperm.slane %v747_v59, %v2052_v62  ;;  %v752_v2 = vrot.slane %v686_v17, 4  ;;  %v764_v61 = vsel %vm147_vm8, %v763_v58, %v688_v44  ;;  %v1150_v25 = vsel %vm855_vm9, %v2383_v6, 0.0 }
 0x3b6   :  { %v768_v53 = vperm.slane %v764_v61, %v2052_v62  ;;  %v783_v18 = vrot.slane %v762_v63, 4 }
 0x3b7   :  { %v753_v4 = vsel %vm147_vm8, %v752_v2, %v684_v3  ;;  %v771_v5 = vrot.slane %v751_v0, 4 }
 0x3b8   :  { %v757_v19 = vperm.slane %v753_v4, %v2052_v62  ;;  %v781_v50 = vrot.slane %v768_v53, 4  ;;  %v784_v7 = vsel %vm147_vm8, %v768_v53, %v783_v18 }
 0x3b9   :  { %v2387_v11 = vpop.eup %1890  ;;  %v792_v16 = vperm.slane %v784_v7, %v2068_v12 }
 0x3ba   :  { %v1156_v20 = vsel %vm855_vm9, %v2387_v11, 0.0  ;;  %v769_v14 = vrot.slane %v757_v19, 4  ;;  %v772_v15 = vsel %vm147_vm8, %v757_v19, %v771_v5  ;;  %v782_v23 = vsel %vm147_vm8, %v781_v50, %v762_v63 }
 0x3bb   :  { %1157 = vadd.xlane.f32.xlu1 %v1156_v20  ;;  %v780_v27 = vperm.slane %v772_v15, %v2068_v12  ;;  %v797_v21 = vrot.slane %v792_v16, 4  ;;  %v788_v29 = vperm.slane %v782_v23, %v2068_v12 }
 0x3bc   :  { %1151 = vadd.xlane.f32.xlu0 %v1150_v25  ;;  %v770_v30 = vsel %vm147_vm8, %v769_v14, %v751_v0 }
 0x3bd   :  { %v1855_v31 = vpop.permute.xlu1 %1854  ;;  %v798_v32 = vsel %vm147_vm8, %v797_v21, %v780_v27  ;;  %v799_v33 = vrot.slane %v780_v27, 4  ;;  %v776_v34 = vperm.slane %v770_v30, %v2068_v12  ;;  %v793_v35 = vrot.slane %v788_v29, 4 }
 0x3be   :  { %v1857_v36 = vunpack.i.h.bf16 %v1855_v31  ;;  %v1856_v38 = vunpack.i.l.bf16 %v1855_v31  ;;  %1239 = vmatpush.msra.mxu1 %v798_v32 }
 0x3bf   :  { %v794_v39 = vsel %vm147_vm8, %v793_v35, %v776_v34  ;;  %v800_v24 = vsel %vm147_vm8, %v792_v16, %v799_v33  ;;  %v795_v40 = vrot.slane %v776_v34, 4 }
 0x3c0   :  { %v1860_v41 = vpop.permute.xlu0 %1859  ;;  %v705_v42 = vrot.slane %v1857_v36, 4  ;;  %v693_v28 = vrot.slane %v1856_v38, 4  ;;  %1193 = vmatpush.msrb.mxu3 %v794_v39  ;;  %1262 = vmatpush.msrb.mxu2 %v800_v24 }
 0x3c1   :  { %v1862_v43 = vunpack.i.h.bf16 %v1860_v41  ;;  %v1861_v45 = vunpack.i.l.bf16 %v1860_v41  ;;  %v796_v46 = vsel %vm147_vm8, %v788_v29, %v795_v40 }
 0x3c2   :  { %1216 = vmatpush.msrb.mxu0 %v796_v46 }
 0x3c3   :  { %v703_v47 = vrot.slane %v1862_v43, 4  ;;  %v691_v48 = vrot.slane %v1861_v45, 4  ;;  %v694_v49 = vsel %vm147_vm8, %v1861_v45, %v693_v28  ;;  %v706_v51 = vsel %vm147_vm8, %v1862_v43, %v705_v42 }
 0x3c4   :  { %v702_v52 = vperm.slane %v694_v49, %v2052_v62  ;;  %v714_v55 = vperm.slane %v706_v51, %v2052_v62 }
 0x3c5   :  { %v692_v9 = vsel %vm147_vm8, %v691_v48, %v1856_v38  ;;  %v704_v54 = vsel %vm147_vm8, %v703_v47, %v1857_v36 }
 0x3c6   :  { %v698_v37 = vperm.slane %v692_v9, %v2052_v62  ;;  %v710_v58 = vperm.slane %v704_v54, %v2052_v62  ;;  %v727_v26 = vrot.slane %v714_v55, 4  ;;  %v729_v8 = vrot.slane %v702_v52, 4 }
 0x3c8   :  { %v715_v17 = vrot.slane %v710_v58, 4  ;;  %v717_v44 = vrot.slane %v698_v37, 4  ;;  %v728_v59 = vsel %vm147_vm8, %v727_v26, %v702_v52  ;;  %v730_v63 = vsel %vm147_vm8, %v714_v55, %v729_v8 }
 0x3c9   :  { %v734_v0 = vperm.slane %v728_v59, %v2068_v12  ;;  %v738_v2 = vperm.slane %v730_v63, %v2068_v12 }
 0x3ca   :  { %v716_v61 = vsel %vm147_vm8, %v715_v17, %v698_v37  ;;  %v718_v3 = vsel %vm147_vm8, %v710_v58, %v717_v44 }
 0x3cb   :  { %v722_v53 = vperm.slane %v716_v61, %v2068_v12  ;;  %v726_v18 = vperm.slane %v718_v3, %v2068_v12  ;;  %v743_v4 = vrot.slane %v734_v0, 4  ;;  %v745_v5 = vrot.slane %v738_v2, 4 }
 0x3cd   :  { %v739_v19 = vrot.slane %v722_v53, 4  ;;  %v741_v50 = vrot.slane %v726_v18, 4  ;;  %v746_v7 = vsel %vm147_vm8, 0.0, %v745_v5  ;;  %v812_v20 = vsel %vm147_vm8, %v745_v5, %v734_v0 }
 0x3ce   :  { %v817_v16 = vrot.slane %v746_v7, 4  ;;  %v744_v23 = vsel %vm147_vm8, 0.0, %v743_v4  ;;  %v816_v25 = vperm.slane %v812_v20, %v2052_v62 }
 0x3cf   :  { %v742_v14 = vsel %vm147_vm8, 0.0, %v741_v50  ;;  %v801_v15 = vsel %vm147_vm8, %v741_v50, %v722_v53  ;;  %v740_v30 = vsel %vm147_vm8, 0.0, %v739_v19 }
 0x3d0   :  { %v806_v27 = vrot.slane %v742_v14, 4  ;;  %v805_v21 = vperm.slane %v801_v15, %v2052_v62  ;;  %v818_v29 = vsel %vm147_vm8, %v817_v16, %v744_v23  ;;  %v837_v32 = vrot.slane %v816_v25, 4 }
 0x3d1   :  { %v822_v31 = vperm.slane %v818_v29, %v2052_v62 }
 0x3d2   :  { %v807_v33 = vsel %vm147_vm8, %v806_v27, %v740_v30  ;;  %v825_v34 = vrot.slane %v805_v21, 4 }
 0x3d3   :  { %v811_v35 = vperm.slane %v807_v33, %v2052_v62  ;;  %v838_v36 = vsel %vm147_vm8, %v822_v31, %v837_v32  ;;  %v835_v38 = vrot.slane %v822_v31, 4 }
 0x3d4   :  { %v846_v39 = vperm.slane %v838_v36, %v2068_v12 }
 0x3d5   :  { %v826_v24 = vsel %vm147_vm8, %v811_v35, %v825_v34  ;;  %v823_v40 = vrot.slane %v811_v35, 4  ;;  %v836_v41 = vsel %vm147_vm8, %v835_v38, %v816_v25 }
 0x3d6   :  { %v834_v42 = vperm.slane %v826_v24, %v2068_v12  ;;  %v851_v28 = vrot.slane %v846_v39, 4  ;;  %v842_v43 = vperm.slane %v836_v41, %v2068_v12 }
 0x3d7   :  { %v824_v45 = vsel %vm147_vm8, %v823_v40, %v805_v21 }
 0x3d8   :  { %v853_v46 = vrot.slane %v834_v42, 4  ;;  %v852_v47 = vsel %vm147_vm8, %v851_v28, %v834_v42  ;;  %v830_v48 = vperm.slane %v824_v45, %v2068_v12  ;;  %v847_v49 = vrot.slane %v842_v43, 4 }
 0x3d9   :  { %1331 = vmatpush.msrb.mxu1 %v852_v47 }
 0x3da   :  { %v854_v51 = vsel %vm147_vm8, %v846_v39, %v853_v46  ;;  %v849_v52 = vrot.slane %v830_v48, 4  ;;  %v848_v55 = vsel %vm147_vm8, %v847_v49, %v830_v48 }
 0x3db   :  { %1354 = vmatpush.msra.mxu2 %v854_v51  ;;  %1285 = vmatpush.msra.mxu3 %v848_v55 }
 0x3dc   :  { %v850_v9 = vsel %vm147_vm8, %v842_v43, %v849_v52 }
 0x3dd   :  { %1308 = vmatpush.msra.mxu0 %v850_v9 }
 0x409   :  { %v1143_v54 = vpop.xlane.xlu1 %1142 }
 0x40a   :  { %1892 = vrcp.f32 %v1143_v54 }
 0x40d   :  { %v1137_v37 = vpop.xlane.xlu2 %1136 }
 0x40e   :  { %1894 = vrcp.f32 %v1137_v37 }
 0x410   :  { %v1893_v58 = vpop.eup %1892 }
 0x411   :  { %v1169_v26 = vmul.f32 %v1893_v58, %v2330_v57 }
 0x413   :  { %1820 = vmatmul.msk.f32.vlgmr.msra.gmra.mxu1 %vm855_vm9, %v1169_v26 }
 0x414   :  { %v1895_v8 = vpop.eup %1894 }
 0x415   :  { %v1167_v17 = vmul.f32 %v1895_v8, %v2334_v60  ;;  %v1140_v44 = vpop.xlane.xlu2 %1139 }
 0x416   :  { %1896 = vrcp.f32 %v1140_v44 }
 0x417   :  { %1818 = vmatmul.msk.f32.vlgmr.msrb.gmra.mxu3 %vm855_vm9, %v1167_v17 }
 0x41c   :  { %v1897_v59 = vpop.eup %1896 }
 0x41d   :  { %v1168_v63 = vmul.f32 %v1897_v59, %v2338_v1  ;;  %v1146_v0 = vpop.xlane.xlu0 %1145 }
 0x41e   :  { %v1155_v2 = vpop.xlane.xlu2 %1154  ;;  %1898 = vrcp.f32 %v1146_v0 }
 0x41f   :  { %1819 = vmatmul.msk.f32.vlgmr.msrb.gmra.mxu0 %vm855_vm9, %v1168_v63  ;;  %1900 = vrcp.f32 %v1155_v2 }
 0x424   :  { %v1899_v61 = vpop.eup %1898 }
 0x425   :  { %v1901_v57 = vpop.eup %1900  ;;  %v1170_v3 = vmul.f32 %v1899_v61, %v2342_v13 }
 0x426   :  { %v1173_v53 = vmul.f32 %v1901_v57, %v2346_v22 }
 0x427   :  { %v1149_v60 = vpop.xlane.xlu0 %1148  ;;  %1821 = vmatmul.msk.f32.vlgmr.msrb.gmra.mxu2 %vm855_vm9, %v1170_v3 }
 0x428   :  { %1902 = vrcp.f32 %v1149_v60  ;;  %1824 = vmatmul.msk.f32.vlgmr.msrb.gmra.mxu1 %vm855_vm9, %v1173_v53 }
 0x42e   :  { %v1903_v18 = vpop.eup %1902  ;;  %v1158_v1 = vpop.xlane.xlu1 %1157 }
 0x42f   :  { %v1171_v4 = vmul.f32 %v1903_v18, %v2368_v56  ;;  %1904 = vrcp.f32 %v1158_v1  ;;  %v1152_v5 = vpop.xlane.xlu0 %1151 }
 0x430   :  { %1906 = vrcp.f32 %v1152_v5 }
 0x431   :  { %1822 = vmatmul.msk.f32.vlgmr.msra.gmra.mxu3 %vm855_vm9, %v1171_v4 }
 0x435   :  { %v1905_v19 = vpop.eup %1904 }
 0x436   :  { %v1907_v50 = vpop.eup %1906  ;;  %v1174_v13 = vmul.f32 %v1905_v19, %v2387_v11 }
 0x437   :  { %v1172_v22 = vmul.f32 %v1907_v50, %v2383_v6 }
 0x438   :  { %1825 = vmatmul.msk.f32.vlgmr.msra.gmra.mxu2 %vm855_vm9, %v1174_v13 }
 0x439   :  { %1823 = vmatmul.msk.f32.vlgmr.msra.gmra.mxu0 %vm855_vm9, %v1172_v22 }
 0x490   :  { %v1241_v20 = vpop.f32.mrf.mxu1 }
 0x491   :  { %v1359_v14 = vrot.slane %v1241_v20, 4 }
 0x49a   :  { %v1195_v7 = vpop.f32.mrf.mxu3 }
 0x49b   :  { %v1361_v16 = vrot.slane %v1195_v7, 4  ;;  %v1360_v23 = vsel %vm147_vm8, %v1359_v14, %v1195_v7 }
 0x49c   :  { %v1218_v15 = vpop.f32.mrf.mxu0  ;;  %v1366_v11 = vperm.slane %v1360_v23, %v2052_v62 }
 0x49d   :  { %v1362_v56 = vsel %vm147_vm8, %v1241_v20, %v1361_v16  ;;  %v1373_v27 = vrot.slane %v1218_v15, 4 }
 0x49e   :  { %v1370_v25 = vperm.slane %v1362_v56, %v2052_v62  ;;  %v1385_v33 = vrot.slane %v1366_v11, 4 }
 0x4a0   :  { %v1397_v30 = vrot.slane %v1370_v25, 4 }
 0x4a5   :  { %v1333_v41 = vpop.f32.mrf.mxu1 }
 0x4a6   :  { %v1415_v51 = vrot.slane %v1333_v41, 4 }
 0x4aa   :  { %v1264_v21 = vpop.f32.mrf.mxu2 }
 0x4ab   :  { %v1371_v6 = vrot.slane %v1264_v21, 4  ;;  %v1374_v29 = vsel %vm147_vm8, %v1264_v21, %v1373_v27 }
 0x4ac   :  { %v1382_v31 = vperm.slane %v1374_v29, %v2052_v62 }
 0x4ad   :  { %v1372_v32 = vsel %vm147_vm8, %v1371_v6, %v1218_v15 }
 0x4ae   :  { %v1378_v34 = vperm.slane %v1372_v32, %v2052_v62  ;;  %v1395_v35 = vrot.slane %v1382_v31, 4  ;;  %v1398_v36 = vsel %vm147_vm8, %v1382_v31, %v1397_v30 }
 0x4af   :  { %v1406_v38 = vperm.slane %v1398_v36, %v2068_v12 }
 0x4b0   :  { %v1383_v39 = vrot.slane %v1378_v34, 4  ;;  %v1386_v24 = vsel %vm147_vm8, %v1378_v34, %v1385_v33  ;;  %v1396_v40 = vsel %vm147_vm8, %v1395_v35, %v1370_v25 }
 0x4b1   :  { %v1394_v42 = vperm.slane %v1386_v24, %v2068_v12  ;;  %v1402_v28 = vperm.slane %v1396_v40, %v2068_v12  ;;  %v1413_v43 = vrot.slane %v1406_v38, 4 }
 0x4b2   :  { %v1384_v45 = vsel %vm147_vm8, %v1383_v39, %v1366_v11 }
 0x4b3   :  { %v1390_v46 = vperm.slane %v1384_v45, %v2068_v12  ;;  %v1409_v47 = vrot.slane %v1394_v42, 4  ;;  %v1411_v48 = vrot.slane %v1402_v28, 4  ;;  %v1414_v49 = vsel %vm147_vm8, 0.0, %v1413_v43 }
 0x4b4   :  { %v1482_v52 = vsel %vm147_vm8, %v1413_v43, %v1402_v28  ;;  %v1487_v55 = vrot.slane %v1414_v49, 4  ;;  %v1287_v9 = vpop.f32.mrf.mxu3 }
 0x4b5   :  { %v1407_v54 = vrot.slane %v1390_v46, 4  ;;  %v1410_v37 = vsel %vm147_vm8, 0.0, %v1409_v47  ;;  %v1412_v58 = vsel %vm147_vm8, 0.0, %v1411_v48  ;;  %v1486_v26 = vperm.slane %v1482_v52, %v2052_v62 }
 0x4b6   :  { %v1476_v8 = vrot.slane %v1410_v37, 4  ;;  %v1416_v17 = vsel %vm147_vm8, %v1415_v51, %v1287_v9  ;;  %v1417_v44 = vrot.slane %v1287_v9, 4  ;;  %v1310_v59 = vpop.f32.mrf.mxu0  ;;  %v1471_v63 = vsel %vm147_vm8, %v1409_v47, %v1390_v46 }
 0x4b7   :  { %v1422_v0 = vperm.slane %v1416_v17, %v2052_v62  ;;  %v1429_v2 = vrot.slane %v1310_v59, 4  ;;  %v1408_v61 = vsel %vm147_vm8, 0.0, %v1407_v54  ;;  %v1475_v57 = vperm.slane %v1471_v63, %v2052_v62 }
 0x4b8   :  { %v1418_v3 = vsel %vm147_vm8, %v1333_v41, %v1417_v44  ;;  %v1477_v53 = vsel %vm147_vm8, %v1476_v8, %v1408_v61  ;;  %v1488_v60 = vsel %vm147_vm8, %v1487_v55, %v1412_v58  ;;  %v1507_v18 = vrot.slane %v1486_v26, 4 }
 0x4b9   :  { %v1426_v1 = vperm.slane %v1418_v3, %v2052_v62  ;;  %v1481_v4 = vperm.slane %v1477_v53, %v2052_v62  ;;  %v1492_v5 = vperm.slane %v1488_v60, %v2052_v62  ;;  %v1441_v19 = vrot.slane %v1422_v0, 4 }
 0x4ba   :  { %v1495_v50 = vrot.slane %v1475_v57, 4 }
 0x4bb   :  { %v1453_v13 = vrot.slane %v1426_v1, 4  ;;  %v1356_v22 = vpop.f32.mrf.mxu2  ;;  %v1508_v7 = vsel %vm147_vm8, %v1492_v5, %v1507_v18  ;;  %v1493_v16 = vrot.slane %v1481_v4, 4  ;;  %v1505_v20 = vrot.slane %v1492_v5, 4 }
 0x4bc   :  { %v1427_v14 = vrot.slane %v1356_v22, 4  ;;  %v1430_v56 = vsel %vm147_vm8, %v1356_v22, %v1429_v2  ;;  %v1496_v15 = vsel %vm147_vm8, %v1481_v4, %v1495_v50  ;;  %v1516_v23 = vperm.slane %v1508_v7, %v2068_v12 }
 0x4bd   :  { %v1438_v25 = vperm.slane %v1430_v56, %v2052_v62  ;;  %v1504_v27 = vperm.slane %v1496_v15, %v2068_v12  ;;  %v1494_v11 = vsel %vm147_vm8, %v1493_v16, %v1475_v57  ;;  %v1506_v21 = vsel %vm147_vm8, %v1505_v20, %v1486_v26 }
 0x4be   :  { %v1428_v6 = vsel %vm147_vm8, %v1427_v14, %v1310_v59  ;;  %v1521_v29 = vrot.slane %v1516_v23, 4  ;;  %v1500_v30 = vperm.slane %v1494_v11, %v2068_v12  ;;  %v1512_v31 = vperm.slane %v1506_v21, %v2068_v12  ;;  %v1614_v11 = vld [vmem:[%s2676_s2 + $0x18] sm:$0xff]  ;;  %v1612_v21 = vld [vmem:[%s2676_s2 + $0x8] sm:$0xff] }
 0x4bf   :  { %v1434_v32 = vperm.slane %v1428_v6, %v2052_v62  ;;  %v1451_v33 = vrot.slane %v1438_v25, 4  ;;  %v1454_v34 = vsel %vm147_vm8, %v1438_v25, %v1453_v13  ;;  %v1523_v35 = vrot.slane %v1504_v27, 4  ;;  %1633 = vmatpush.msrb.mxu3 %v1614_v11  ;;  %v1611_v6 = vld [vmem:[%s2676_s2] sm:$0xff] }
 0x4c0   :  { %v1462_v36 = vperm.slane %v1454_v34, %v2068_v12  ;;  %v1522_v38 = vsel %vm147_vm8, %v1521_v29, %v1504_v27  ;;  %v1517_v39 = vrot.slane %v1512_v31, 4  ;;  %v1519_v24 = vrot.slane %v1500_v30, 4 }
 0x4c1   :  { %v1439_v40 = vrot.slane %v1434_v32, 4  ;;  %v1442_v41 = vsel %vm147_vm8, %v1434_v32, %v1441_v19  ;;  %v1452_v42 = vsel %vm147_vm8, %v1451_v33, %v1426_v1  ;;  %1589 = vrot.lane.b32.xlu2 %v1522_v38, %s1948_s21  ;;  %v1524_v28 = vsel %vm147_vm8, %v1516_v23, %v1523_v35 }
 0x4c2   :  { %v1450_v43 = vperm.slane %v1442_v41, %v2068_v12  ;;  %v1458_v45 = vperm.slane %v1452_v42, %v2068_v12  ;;  %v1469_v46 = vrot.slane %v1462_v36, 4  ;;  %1597 = vrot.lane.b32.xlu0 %v1524_v28, %s1949_s22  ;;  %v1520_v47 = vsel %vm147_vm8, %v1512_v31, %v1519_v24  ;;  %v1865_v41 = vld [vmem:[%s2680_s6 + $0x4] ss:$0 sm:$0xff] }
 0x4c3   :  { %v1440_v48 = vsel %vm147_vm8, %v1439_v40, %v1422_v0  ;;  %1581 = vrot.lane.b32.xlu1 %v1520_v47, %s1950_s23  ;;  %v1518_v49 = vsel %vm147_vm8, %v1517_v39, %v1500_v30  ;;  %v1912_v28 = vld [vmem:[%s2674_s0] sm:$0xff] }
 0x4c4   :  { %v1446_v51 = vperm.slane %v1440_v48, %v2068_v12  ;;  %v1465_v52 = vrot.slane %v1450_v43, 4  ;;  %v1467_v55 = vrot.slane %v1458_v45, 4  ;;  %v1470_v9 = vsel %vm147_vm8, 0.0, %v1469_v46  ;;  %v1913_v48 = vld [vmem:[%s2674_s0 + $0x8] sm:$0xff] }
 0x4c5   :  { %v1536_v54 = vsel %vm147_vm8, %v1469_v46, %v1458_v45  ;;  %v1541_v37 = vrot.slane %v1470_v9, 4 }
 0x4c6   :  { %v1463_v58 = vrot.slane %v1446_v51, 4  ;;  %v1466_v26 = vsel %vm147_vm8, 0.0, %v1465_v52  ;;  %v1468_v8 = vsel %vm147_vm8, 0.0, %v1467_v55  ;;  %v1540_v17 = vperm.slane %v1536_v54, %v2052_v62 }
 0x4c7   :  { %v1530_v44 = vrot.slane %v1466_v26, 4  ;;  %v1525_v59 = vsel %vm147_vm8, %v1465_v52, %v1446_v51  ;;  %v1542_v63 = vsel %vm147_vm8, %v1541_v37, %v1468_v8 }
 0x4c8   :  { %v1464_v0 = vsel %vm147_vm8, 0.0, %v1463_v58  ;;  %v1529_v2 = vperm.slane %v1525_v59, %v2052_v62  ;;  %v1546_v61 = vperm.slane %v1542_v63, %v2052_v62  ;;  %v1561_v57 = vrot.slane %v1540_v17, 4 }
 0x4c9   :  { %v1531_v3 = vsel %vm147_vm8, %v1530_v44, %v1464_v0 }
 0x4ca   :  { %v1535_v53 = vperm.slane %v1531_v3, %v2052_v62  ;;  %v1549_v60 = vrot.slane %v1529_v2, 4  ;;  %v1562_v18 = vsel %vm147_vm8, %v1546_v61, %v1561_v57  ;;  %v1559_v1 = vrot.slane %v1546_v61, 4  ;;  %v1702_v61 = vld [vmem:[%s2677_s3 + $0x18] sm:$0xff]  ;;  %v1701_v57 = vld [vmem:[%s2677_s3 + $0x10] sm:$0xff]  ;;  %v1700_v3 = vld [vmem:[%s2677_s3 + $0x8] sm:$0xff] }
 0x4cb   :  { %v1570_v4 = vperm.slane %v1562_v18, %v2068_v12  ;;  %1725 = vmatpush.msrb.mxu0 %v1702_v61 }
 0x4cc   :  { %v1550_v5 = vsel %vm147_vm8, %v1535_v53, %v1549_v60  ;;  %v1547_v19 = vrot.slane %v1535_v53, 4  ;;  %v1560_v50 = vsel %vm147_vm8, %v1559_v1, %v1540_v17  ;;  %v1699_v53 = vld [vmem:[%s2677_s3] sm:$0xff] }
 0x4cd   :  { %v1558_v13 = vperm.slane %v1550_v5, %v2068_v12  ;;  %v1575_v22 = vrot.slane %v1570_v4, 4  ;;  %v1566_v7 = vperm.slane %v1560_v50, %v2068_v12  ;;  %1726 = vmatpush.msrb.mxu0 %v1701_v57  ;;  %v1752_v5 = vld [vmem:[%s2679_s5 + $0x70] sm:$0xff]  ;;  %v1751_v50 = vld [vmem:[%s2679_s5 + $0x68] sm:$0xff] }
 0x4ce   :  { %v1548_v16 = vsel %vm147_vm8, %v1547_v19, %v1529_v2 }
 0x4cf   :  { %v1576_v62 = vsel %vm147_vm8, %v1575_v22, %v1558_v13  ;;  %v1577_v20 = vrot.slane %v1558_v13, 4  ;;  %v1554_v14 = vperm.slane %v1548_v16, %v2068_v12  ;;  %v1571_v56 = vrot.slane %v1566_v7, 4  ;;  %v1613_v12 = vld [vmem:[%s2676_s2 + $0x10] sm:$0xff]  ;;  %1727 = vmatpush.msrb.mxu0 %v1700_v3  ;;  %v1750_v16 = vld [vmem:[%s2679_s5 + $0x60] sm:$0xff] }
 0x4d0   :  { %1591 = vrot.lane.b32.xlu0 %v1576_v62, %s1948_s21  ;;  %1634 = vmatpush.msrb.mxu3 %v1613_v12  ;;  %v1746_v12 = vld [vmem:[%s2679_s5 + $0x40] sm:$0xff] }
 0x4d1   :  { %v1578_v15 = vsel %vm147_vm8, %v1570_v4, %v1577_v20  ;;  %v1573_v23 = vrot.slane %v1554_v14, 4  ;;  %v1572_v25 = vsel %vm147_vm8, %v1571_v56, %v1554_v14  ;;  %1728 = vmatpush.msrb.mxu0 %v1699_v53  ;;  %v1753_v4 = vld [vmem:[%s2679_s5 + $0x78] sm:$0xff]  ;;  %v1866_v56 = vld [vmem:[%s2680_s6 + $0x2] ss:$0 sm:$0xff] }
 0x4d2   :  { %1599 = vrot.lane.b32.xlu2 %v1578_v15, %s1949_s22  ;;  %1635 = vmatpush.msrb.mxu3 %v1612_v21  ;;  %v1749_v14 = vld [vmem:[%s2679_s5 + $0x58] sm:$0xff] }
 0x4d3   :  { %v1574_v27 = vsel %vm147_vm8, %v1566_v7, %v1573_v23  ;;  %1755 = vmatpush.msra.mxu1 %v1753_v4 }
 0x4d4   :  { %1583 = vrot.lane.b32.xlu1 %v1574_v27, %s1950_s23  ;;  %1636 = vmatpush.msrb.mxu3 %v1611_v6  ;;  %v1747_v27 = vld [vmem:[%s2679_s5 + $0x48] sm:$0xff] }
 0x4d5   :  { %1756 = vmatpush.msra.mxu1 %v1752_v5 }
 0x4d7   :  { %1757 = vmatpush.msra.mxu1 %v1751_v50 }
 0x4d9   :  { %1758 = vmatpush.msra.mxu1 %v1750_v16 }
 0x4db   :  { %1759 = vmatpush.msra.mxu1 %v1749_v14 }
 0x51b   :  { %v1590_v30 = vpop.permute.xlu2 %1589 }
 0x52c   :  { %v1600_v39 = vpop.permute.xlu2 %1599 }
 0x534   :  { %v1598_v32 = vpop.permute.xlu0 %1597 }
 0x535   :  { %v1582_v29 = vpop.permute.xlu1 %1581 }
 0x536   :  { %v1603_v31 = vsel %vm855_vm9, %v1518_v49, %v1582_v29  ;;  %v1745_v29 = vld [vmem:[%s2679_s5 + $0x38] sm:$0xff] }
 0x537   :  { %v1606_v33 = vsel %vm1605_vm11, %v1603_v31, %v1590_v30  ;;  %v1744_v31 = vld [vmem:[%s2679_s5 + $0x30] sm:$0xff] }
 0x538   :  { %v1609_v34 = vsel %vm1608_vm12, %v1606_v33, %v1598_v32  ;;  %v1743_v33 = vld [vmem:[%s2679_s5 + $0x28] sm:$0xff] }
 0x539   :  { %1826 = vmatmul.msk.f32.vlgmr.msrb.gmra.mxu3 %vm35_vm0, %v1609_v34 }
 0x542   :  { %v1592_v36 = vpop.permute.xlu0 %1591 }
 0x546   :  { %v1584_v35 = vpop.permute.xlu1 %1583 }
 0x547   :  { %v1604_v38 = vsel %vm855_vm9, %v1572_v25, %v1584_v35  ;;  %v1867_v25 = vld [vmem:[%s2680_s6 + $0x3] ss:$0 sm:$0xff] }
 0x548   :  { %v1607_v24 = vsel %vm1605_vm11, %v1604_v38, %v1592_v36  ;;  %v1742_v35 = vld [vmem:[%s2679_s5 + $0x20] sm:$0xff]  ;;  %v1741_v38 = vld [vmem:[%s2679_s5 + $0x18] sm:$0xff] }
 0x549   :  { %v1610_v40 = vsel %vm1608_vm12, %v1607_v24, %v1600_v39 }
 0x54a   :  { %1827 = vmatmul.msk.f32.gmra.mxu3 %vm35_vm0, %v1610_v40 }
 0x5bc   :  { %v1638_v42 = vpop.f32.mrf.mxu3 }
 0x5bd   :  { %v1644_v43 = vadd.f32 %v1912_v28, %v1638_v42  ;;  %v1740_v28 = vld [vmem:[%s2679_s5 + $0x10] sm:$0xff] }
 0x5bf   :  { %v2568_v45 = vadd.f32 %v1865_v41, %v1644_v43  ;;  %v1739_v43 = vld [vmem:[%s2679_s5 + $0x8] sm:$0xff] }
 0x5c1   :  { %v1649_v46 = vsel %vm35_vm0, %v2568_v45, 0.0 }
 0x5c2   :  { %1650 = vadd.xlane.f32.xlu1 %v1649_v46  ;;  %v1738_v46 = vld [vmem:[%s2679_s5] sm:$0xff] }
 0x5cd   :  { %v1641_v47 = vpop.f32.mrf.mxu3 }
 0x5ce   :  { %v1645_v49 = vadd.f32 %v1913_v48, %v1641_v47  ;;  %v1868_v47 = vld [vmem:[%s2678_s4] ss:$0 sm:$0xff] }
 0x5d0   :  { %v2575_v51 = vadd.f32 %v1865_v41, %v1645_v49 }
 0x5d2   :  { %v1652_v52 = vsel %vm35_vm0, %v2575_v51, 0.0 }
 0x5d3   :  { %1653 = vadd.xlane.f32.xlu0 %v1652_v52 }
 0x635   :  { %v1651_v55 = vpop.xlane.xlu1 %1650 }
 0x636   :  { %v1655_v9 = vmul.f32 %v1651_v55, %v2001_v10 }
 0x638   :  { %v1657_v54 = vsub.f32 %v2568_v45, %v1655_v9 }
 0x63a   :  { %v1659_v37 = vmul.f32 %v1657_v54, %v1657_v54 }
 0x63c   :  { %v1661_v58 = vsel %vm35_vm0, %v1659_v37, 0.0  ;;  %v1869_v37 = vld [vmem:[%s2680_s6 + $0x5] ss:$0 sm:$0xff]  ;;  %s1952_s6 = smov 128  }
 0x63d   :  { %1662 = vadd.xlane.f32.xlu2 %v1661_v58 }
 0x646   :  { %v1654_v26 = vpop.xlane.xlu0 %1653 }
 0x647   :  { %v1656_v8 = vmul.f32 %v1654_v26, %v2001_v10 }
 0x649   :  { %v2584_v17 = vsub.f32 %v2575_v51, %v1656_v8 }
 0x64b   :  { %v1660_v44 = vmul.f32 %v2584_v17, %v2584_v17 }
 0x64d   :  { %v1664_v59 = vsel %vm35_vm0, %v1660_v44, 0.0 }
 0x64e   :  { %1665 = vadd.xlane.f32.xlu1 %v1664_v59 }
 0x6b0   :  { %v1663_v63 = vpop.xlane.xlu2 %1662 }
 0x6b1   :  { %v1667_v0 = vmul.f32 %v1663_v63, %v2001_v10 }
 0x6b3   :  { %v1669_v2 = vadd.f32 1e-05, %v1667_v0 }
 0x6b5   :  { %1908 = vrsqrt.f32 %v1669_v2  ;;  %vm1677_vm14 = vweird.f32 %v1669_v2 }
 0x6bb   :  { %v1909_v60 = vpop.eup %1908 }
 0x6bc   :  { %v1672_v18 = vmul.f32 %v1909_v60, %v1669_v2  ;;  %vm1678_vm13 = vweird.f32 %v1909_v60 }
 0x6bd   :  { %vm1679_vm15 = vmor %vm1677_vm14, %vm1678_vm13 }
 0x6be   :  { %v1673_v1 = vmul.f32 %v1909_v60, %v1672_v18 }
 0x6c0   :  { %v1674_v19 = vmul.f32 0.5, %v1673_v1 }
 0x6c1   :  { %v1666_v13 = vpop.xlane.xlu1 %1665 }
 0x6c2   :  { %v1675_v22 = vsub.f32 1.5, %v1674_v19  ;;  %v1668_v7 = vmul.f32 %v1666_v13, %v2001_v10  ;;  %v1748_v10 = vld [vmem:[%s2679_s5 + $0x50] sm:$0xff] }
 0x6c3   :  { %1760 = vmatpush.msra.mxu1 %v1748_v10 }
 0x6c4   :  { %v1676_v62 = vmul.f32 %v1909_v60, %v1675_v22  ;;  %v1670_v20 = vadd.f32 1e-05, %v1668_v7 }
 0x6c5   :  { %1761 = vmatpush.msra.mxu1 %v1747_v27 }
 0x6c6   :  { %v1680_v15 = vsel %vm1679_vm15, %v1909_v60, %v1676_v62  ;;  %1910 = vrsqrt.f32 %v1670_v20  ;;  %vm1687_vm2 = vweird.f32 %v1670_v20 }
 0x6c7   :  { %v1691_v23 = vmul.f32 %v1680_v15, %v1657_v54  ;;  %1762 = vmatpush.msra.mxu1 %v1746_v12 }
 0x6c9   :  { %v1694_v11 = vmul.f32 %v1866_v56, %v1691_v23  ;;  %1763 = vmatpush.msra.mxu1 %v1745_v29 }
 0x6cb   :  { %v1697_v21 = vadd.f32 %v1867_v25, %v1694_v11  ;;  %1764 = vmatpush.msra.mxu1 %v1744_v31 }
 0x6cc   :  { %v1911_v6 = vpop.eup %1910 }
 0x6cd   :  { %v1682_v30 = vmul.f32 %v1911_v6, %v1670_v20  ;;  %1828 = vmatmul.msk.f32.vlgmr.msrb.gmra.mxu0 %vm35_vm0, %v1697_v21  ;;  %vm1688_vm1 = vweird.f32 %v1911_v6  ;;  %1765 = vmatpush.msra.mxu1 %v1743_v33 }
 0x6ce   :  { %vm1689_vm3 = vmor %vm1687_vm2, %vm1688_vm1 }
 0x6cf   :  { %v1683_v32 = vmul.f32 %v1911_v6, %v1682_v30  ;;  %1766 = vmatpush.msra.mxu1 %v1742_v35 }
 0x6d1   :  { %v1684_v34 = vmul.f32 0.5, %v1683_v32  ;;  %1767 = vmatpush.msra.mxu1 %v1741_v38 }
 0x6d3   :  { %v1685_v36 = vsub.f32 1.5, %v1684_v34  ;;  %1768 = vmatpush.msra.mxu1 %v1740_v28 }
 0x6d5   :  { %v1686_v39 = vmul.f32 %v1911_v6, %v1685_v36  ;;  %1769 = vmatpush.msra.mxu1 %v1739_v43 }
 0x6d7   :  { %v1690_v24 = vsel %vm1689_vm3, %v1911_v6, %v1686_v39  ;;  %1770 = vmatpush.msra.mxu1 %v1738_v46 }
 0x6d8   :  { %v1692_v40 = vmul.f32 %v1690_v24, %v2584_v17 }
 0x6da   :  { %v1695_v41 = vmul.f32 %v1866_v56, %v1692_v40 }
 0x6dc   :  { %v1698_v42 = vadd.f32 %v1867_v25, %v1695_v41 }
 0x6de   :  { %1829 = vmatmul.msk.f32.gmra.mxu0 %vm35_vm0, %v1698_v42 }
 0x74a   :  { %v1730_v48 = vpop.f32.mrf.mxu0 }
 0x74b   :  { %v1731_v49 = vadd.f32 %v1868_v47, %v1730_v48 }
 0x74d   :  { %v1736_v52 = vmax.f32 %v1731_v49, 0.0 }
 0x74f   :  { %1771 = vmatmul.f32.vlgmr.msra.gmra.mxu1 %v1736_v52 }
 0x75b   :  { %v1733_v55 = vpop.f32.mrf.mxu0 }
 0x75c   :  { %v1734_v9 = vadd.f32 %v1868_v47, %v1733_v55 }
 0x75e   :  { %v1737_v54 = vmax.f32 %v1734_v9, 0.0 }
 0x760   :  { %1774 = vmatmul.f32.gmra.mxu1 %v1737_v54 }
 0x7cc   :  { %v1772_v58 = vpop.f32.mrf.mxu1 }
 0x7cd   :  { %v1773_v26 = vadd.f32 %v1869_v37, %v1772_v58 }
 0x7cf   :  { %v1778_v8 = vadd.f32 %v1773_v26, %v2568_v45 }
 0x7d1   :  { %1780 = vst.msk [vmem:[#allocation2] sm:$0xff] %vm35_vm0, %v1778_v8 }
 0x7dd   :  { %v1775_v17 = vpop.f32.mrf.mxu1 }
 0x7de   :  { %v1776_v44 = vadd.f32 %v1869_v37, %v1775_v17 }
 0x7e0   :  { %v1779_v59 = vadd.f32 %v1776_v44, %v2575_v51 }
 0x7e2   :  { %1781 = vst.msk [vmem:[#allocation2 + $0x8] sm:$0xff] %vm35_vm0, %v1779_v59 }
 0x7e3   :  { %1794 = dma.vmem_to_hbm [thread:$0]  %s1787_s12, 256, %s1789_s10, [#allocation3], %s1952_s6, %s1952_s6, %s1950_s23  }
 0x7e4   :  { %1938 = dma.done.wait [#allocation3], 256  }
 0x7e5   :  { %1939 = vsyncadd [#allocation3], 4294967040 }
 0x7e6   :  { %1799 = vsyncpa [#allocation3], 1 }

</bundles_post_ra>
